<compile_context>
chip_gen: v5e
topology: v5e:2x2
jax: 0.10.0
libtpu: 0.0.40
codegen_flags: <defaults>
</compile_context>

<pallas_src>
import functools

import jax
import jax.numpy as jnp
from jax.experimental import pallas as pl
from jax.experimental.pallas import tpu as pltpu

_MIB = 1024 * 1024
_LANE = 128


def _round_up(n, m):
    return ((n + m - 1) // m) * m


def _vmem_limit_bytes(est_bytes):
    """Scoped-VMEM request: actual footprint + headroom, capped at 75% physical."""
    try:
        cap = int(pltpu.get_tpu_info().vmem_capacity_bytes)
    except Exception:
        cap = 64 * _MIB                      # v7x per-core physical VMEM (worst case)
    cap = (3 * cap) // 4                     # leave headroom for compiler scratch
    return int(min(max(int(est_bytes * 1.25), 32 * _MIB), cap))


@functools.lru_cache(maxsize=None)
def _single_buffer_supported():
    """Probe pipeline_mode=pl.Buffered(1) support; fall back to default buffering."""
    def _probe(x_ref, o_ref):
        o_ref[...] = x_ref[...]
    try:
        spec = pl.BlockSpec((8, _LANE), lambda i: (0, 0), pipeline_mode=pl.Buffered(1))
        out = pl.pallas_call(
            _probe, grid=(2,),
            in_specs=[spec],
            out_specs=pl.BlockSpec((8, _LANE), lambda i: (0, 0)),
            out_shape=jax.ShapeDtypeStruct((8, _LANE), jnp.float32),
        )(jnp.zeros((8, _LANE), jnp.float32))
        jax.block_until_ready(out)
        return True
    except Exception:
        return False


def _const_spec(shape):
    """Full-array block whose index never changes: single-buffer it if supported."""
    n = len(shape)
    index_map = lambda b, t, _n=n: (0,) * _n
    if _single_buffer_supported():
        return pl.BlockSpec(shape, index_map, pipeline_mode=pl.Buffered(1))
    return pl.BlockSpec(shape, index_map)


# -----------------------------------------------------------------------------
# Fused encoder-layer kernel.  Grid: (batch, query-tile) = (parallel, arbitrary).
# K/V are projected once per batch element (t == 0) into VMEM scratch; every
# grid step then handles one query tile end-to-end (attn + out-proj + LN + FFN).
# -----------------------------------------------------------------------------
def _encoder_layer_kernel(
        x_ref, mask_ref,
        wq_ref, bq_ref, wk_ref, bk_ref, wv_ref, bv_ref,
        wo_ref, bo_ref, w1_ref, b1_ref, w2_ref, b2_ref,
        g1_ref, be1_ref, g2_ref, be2_ref,
        y_ref, attn_ref,
        kh_ref, vh_ref,
        *, num_heads, q_tile, true_e):
    H = num_heads
    TQ = q_tile
    t = pl.program_id(1)
    s_pad = x_ref.shape[1]
    e_pad = x_ref.shape[2]

    # ---- K/V projection: once per batch element, kept resident in VMEM scratch.
    @pl.when(t == 0)
    def _():
        xb = x_ref[0].astype(jnp.bfloat16)                          # (S_pad, E_pad)
        xh = jnp.broadcast_to(xb[None], (H, s_pad, e_pad))          # head-batched lhs
        k = jnp.einsum('hse,hed->hsd', xh, wk_ref[...],
                       preferred_element_type=jnp.float32) + bk_ref[...]
        v = jnp.einsum('hse,hed->hsd', xh, wv_ref[...],
                       preferred_element_type=jnp.float32) + bv_ref[...]
        kh_ref[...] = k.astype(jnp.bfloat16)                        # (H, S_pad, Dh)
        vh_ref[...] = v.astype(jnp.bfloat16)

    # ---- Q projection for this query tile (1/sqrt(Dh) already folded into wq/bq).
    qs = pl.multiple_of(t * TQ, TQ)
    x_q = x_ref[0, pl.ds(qs, TQ), :]                                # (TQ, E_pad) f32 residual
    xqh = jnp.broadcast_to(x_q.astype(jnp.bfloat16)[None], (H, TQ, e_pad))
    qh = jnp.einsum('hqe,hed->hqd', xqh, wq_ref[...],
                    preferred_element_type=jnp.float32) + bq_ref[...]
    qh = qh.astype(jnp.bfloat16)                                    # (H, TQ, Dh)

    # ---- scores + softmax (f32).  -inf mask == PyTorch semantics
    # (an all-masked row would give NaN, exactly like nn.MultiheadAttention).
    neg = jnp.where(mask_ref[0] > 0.5, -jnp.inf, 0.0)               # (1, S_pad)
    s = jnp.einsum('hqd,hkd->hqk', qh, kh_ref[...],
                   preferred_element_type=jnp.float32)              # (H, TQ, S_pad)
    s = s + neg[None]
    m = jnp.max(s, axis=-1, keepdims=True)
    e = jnp.exp(s - m)
    p = e * (1.0 / jnp.sum(e, axis=-1, keepdims=True))              # exact: rows sum to 1

    # head-averaged attention weights (user-visible module output).
    attn_ref[0] = (jnp.sum(p, axis=0) * (1.0 / H)).astype(attn_ref.dtype)

    # ---- attention output + out-projection: head-batched matmul, then a
    # cross-head sum in f32 (no lane-axis concatenation of Dh-wide slabs).
    o = jnp.einsum('hqk,hkd->hqd', p.astype(jnp.bfloat16), vh_ref[...],
                   preferred_element_type=jnp.float32)              # (H, TQ, Dh)
    proj_h = jnp.einsum('hqd,hde->hqe', o.astype(jnp.bfloat16), wo_ref[...],
                        preferred_element_type=jnp.float32)         # (H, TQ, E_pad)
    proj = jnp.sum(proj_h, axis=0) + bo_ref[...]                    # (TQ, E_pad)

    # ---- LayerNorm over the TRUE E features only.  Padded feature columns are
    # exactly zero on every input/output (zero-padded weights, biases, gamma,
    # beta), so sum(z) is already the true-column sum and the variance only
    # needs the (E_pad - E) * mu^2 correction.
    inv_e = 1.0 / float(true_e)
    n_pad = float(e_pad - true_e)

    def ln(z, g, b):
        mu = jnp.sum(z, axis=-1, keepdims=True) * inv_e
        d = z - mu
        var = (jnp.sum(d * d, axis=-1, keepdims=True) - n_pad * mu * mu) * inv_e
        return d * jax.lax.rsqrt(var + 1e-5) * g + b

    src = ln(x_q + proj, g1_ref[...], be1_ref[...])

    # ---- FFN (linear1 -> ReLU -> linear2), bf16 MXU / f32 accumulation.
    ff = jnp.maximum(jnp.dot(src.astype(jnp.bfloat16), w1_ref[...],
                             preferred_element_type=jnp.float32) + b1_ref[...], 0.0)
    ff = jnp.dot(ff.astype(jnp.bfloat16), w2_ref[...],
                 preferred_element_type=jnp.float32) + b2_ref[...]
    y_ref[0] = ln(src + ff, g2_ref[...], be2_ref[...]).astype(y_ref.dtype)


# -----------------------------------------------------------------------------
# Per-layer wrapper.
# -----------------------------------------------------------------------------
def encoder_layer_pallas(x, mask_b1s, w, num_heads, q_tile, true_e,
                         attn_dtype=jnp.float32):
    B, S_pad, E_pad = x.shape
    H = num_heads
    Dh = w["wq"].shape[-1]
    F_pad = w["w1"].shape[1]
    TQ = q_tile
    n_tiles = S_pad // TQ
    assert true_e == H * Dh

    # VMEM footprint estimate: weights single-buffered, x/mask/outputs
    # double-buffered, K/V scratch, plus the in-kernel f32 working set.
    weight_bytes = (3 * H * E_pad * Dh * 2 + 3 * H * Dh * 4
                    + H * Dh * E_pad * 2
                    + E_pad * F_pad * 2 + F_pad * E_pad * 2
                    + (6 * E_pad + F_pad) * 4)
    io_bytes = 2 * (S_pad * E_pad * 4 + S_pad * 4
                    + TQ * E_pad * 4 + TQ * S_pad * 4)
    scratch_bytes = 2 * H * S_pad * Dh * 2
    work_bytes = (H * S_pad * E_pad * 2 + H * TQ * E_pad * 2       # broadcast lhs
                  + 2 * H * S_pad * Dh * 4                          # k/v f32 temporaries
                  + 4 * H * TQ * S_pad * 4                          # s / e / p / slack
                  + 3 * H * TQ * E_pad * 4                          # o / proj_h
                  + 2 * TQ * F_pad * 4 + 8 * TQ * E_pad * 4)
    limit = _vmem_limit_bytes(weight_bytes + io_bytes + scratch_bytes + work_bytes)

    in_specs = [
        # full sequence for this batch element: block index constant in t =>
        # one DMA per batch element; f32 because it is also the residual input.
        pl.BlockSpec((1, S_pad, E_pad), lambda b, t: (b, 0, 0)),
        pl.BlockSpec((1, 1, S_pad), lambda b, t: (b, 0, 0)),        # key-padding mask
        _const_spec((H, E_pad, Dh)), _const_spec((H, 1, Dh)),       # wq, bq (scaled)
        _const_spec((H, E_pad, Dh)), _const_spec((H, 1, Dh)),       # wk, bk
        _const_spec((H, E_pad, Dh)), _const_spec((H, 1, Dh)),       # wv, bv
        _const_spec((H, Dh, E_pad)), _const_spec((1, E_pad)),       # wo, bo
        _const_spec((E_pad, F_pad)), _const_spec((1, F_pad)),       # linear1
        _const_spec((F_pad, E_pad)), _const_spec((1, E_pad)),       # linear2
        _const_spec((1, E_pad)), _const_spec((1, E_pad)),           # norm1 gamma/beta
        _const_spec((1, E_pad)), _const_spec((1, E_pad)),           # norm2 gamma/beta
    ]
    out_specs = (pl.BlockSpec((1, TQ, E_pad), lambda b, t: (b, t, 0)),
                 pl.BlockSpec((1, TQ, S_pad), lambda b, t: (b, t, 0)))
    out_shape = (jax.ShapeDtypeStruct((B, S_pad, E_pad), jnp.float32),
                 jax.ShapeDtypeStruct((B, S_pad, S_pad), attn_dtype))

    kern = functools.partial(_encoder_layer_kernel, num_heads=H, q_tile=TQ,
                             true_e=true_e)
    y, attn = pl.pallas_call(
        kern,
        grid=(B, n_tiles),                      # b: megacore parallel; t carries K/V scratch
        in_specs=in_specs,
        out_specs=out_specs,
        out_shape=out_shape,
        scratch_shapes=[pltpu.VMEM((H, S_pad, Dh), jnp.bfloat16),   # K heads (per batch)
                        pltpu.VMEM((H, S_pad, Dh), jnp.bfloat16)],  # V heads (per batch)
        compiler_params=pltpu.CompilerParams(
            dimension_semantics=("parallel", "arbitrary"),
            vmem_limit_bytes=limit),
    )(x, mask_b1s,
      w["wq"], w["bq"], w["wk"], w["bk"], w["wv"], w["bv"],
      w["wo"], w["bo"], w["w1"], w["b1"], w["w2"], w["b2"],
      w["g1"], w["be1"], w["g2"], w["be2"])
    return y, attn


# -----------------------------------------------------------------------------
# One-time weight preparation: head split, transpose to matmul orientation,
# fold 1/sqrt(Dh) into W_q/b_q, zero-pad E/F to lane (128) multiples, cast
# matmul weights to bf16 (biases / LN params stay f32, zero-padded).
# -----------------------------------------------------------------------------
def prepare_encoder_params(params_list, num_heads, lane=_LANE):
    prepared = []
    for p in params_list:
        E = p["out_w"].shape[0]
        F = p["w1"].shape[0]
        H = num_heads
        assert E % H == 0
        Dh = E // H
        e_pad = _round_up(E, lane)
        f_pad = _round_up(F, lane)
        scale = 1.0 / float(Dh) ** 0.5
        bf = jnp.bfloat16

        def head_w(wmat):                        # (E_out, E_in) -> (H, E_pad, Dh) bf16
            wt = jnp.pad(wmat.T, ((0, e_pad - E), (0, 0)))
            return jnp.transpose(wt.reshape(e_pad, H, Dh), (1, 0, 2)).astype(bf)

        def head_b(bvec):                        # (E,) -> (H, 1, Dh) f32
            return bvec.reshape(H, 1, Dh).astype(jnp.float32)

        def pad_row(a, n):                       # (1, X) -> (1, n) f32, zero pad
            return jnp.pad(a, ((0, 0), (0, n - a.shape[1]))).astype(jnp.float32)

        def pad2(a, r, c):                       # 2-D zero pad + bf16 cast
            return jnp.pad(a, ((0, r - a.shape[0]), (0, c - a.shape[1]))).astype(bf)

        in_b = p["in_b"][0]
        wo_hde = jnp.pad(p["out_w"].T, ((0, 0), (0, e_pad - E)))
        wo_hde = wo_hde.reshape(H, Dh, e_pad).astype(bf)             # (H, Dh, E_pad)

        prepared.append(dict(
            wq=head_w(p["in_w"][:E] * scale), bq=head_b(in_b[:E] * scale),
            wk=head_w(p["in_w"][E:2 * E]),    bk=head_b(in_b[E:2 * E]),
            wv=head_w(p["in_w"][2 * E:]),     bv=head_b(in_b[2 * E:]),
            wo=wo_hde,                        bo=pad_row(p["out_b"], e_pad),
            w1=pad2(p["w1"].T, e_pad, f_pad), b1=pad_row(p["b1"], f_pad),
            w2=pad2(p["w2"].T, f_pad, e_pad), b2=pad_row(p["b2"], e_pad),
            g1=pad_row(p["g1"], e_pad), be1=pad_row(p["be1"], e_pad),
            g2=pad_row(p["g2"], e_pad), be2=pad_row(p["be2"], e_pad),
        ))
    return prepared


# -----------------------------------------------------------------------------
# TransformerEncoder.forward equivalent.
# -----------------------------------------------------------------------------
def transformer_encoder_forward(x_sbe, key_padding_mask, prepared_params,
                                num_heads, q_tile=None, attn_dtype=jnp.float32):
    S, B, E = x_sbe.shape
    if not prepared_params:
        return x_sbe, None
    E_pad = prepared_params[0]["g1"].shape[1]

    # q-tile policy: larger tiles amortize per-grid-step overhead on v5e/v6e
    # (128 MiB VMEM); _vmem_limit_bytes caps the request with headroom on v7x.
    if q_tile is None:
        if S >= 1024:
            q_tile = 256
        elif S >= 128:
            q_tile = 128
        else:
            q_tile = _round_up(S, 8)
    S_pad = _round_up(S, q_tile)

    x = jnp.transpose(x_sbe, (1, 0, 2)).astype(jnp.float32)         # (B, S, E)
    x = jnp.pad(x, ((0, 0), (0, S_pad - S), (0, E_pad - E)))        # seq + lane pad
    mask = key_padding_mask
    if S_pad != S:                                                   # pad => masked key
        mask = jnp.pad(mask, ((0, 0), (0, S_pad - S)), constant_values=True)
    mask_b1s = mask.astype(jnp.float32).reshape(B, 1, S_pad)

    weights = []
    for w in prepared_params:                                        # layers sequential
        x, aw = encoder_layer_pallas(x, mask_b1s, w, num_heads, q_tile,
                                     true_e=E, attn_dtype=attn_dtype)
        weights.append(aw[:, :S, :S].astype(jnp.float32))
    out = jnp.transpose(x[:, :S, :E], (1, 0, 2))                     # back to (S, B, E)
    return out, jnp.stack(weights, axis=0)                           # (L, B, S, S)


# -----------------------------------------------------------------------------
# Pure-JAX f32 reference (PyTorch-equivalent math) for correctness checking.
# -----------------------------------------------------------------------------
def _ref_forward(x_sbe, mask, params_list, num_heads):
    S, B, E = x_sbe.shape
    H = num_heads
    Dh = E // H
    x = jnp.transpose(x_sbe, (1, 0, 2))
    ws = []

    def ln(z, g, b):
        mu = z.mean(-1, keepdims=True)
        var = ((z - mu) ** 2).mean(-1, keepdims=True)
        return (z - mu) / jnp.sqrt(var + 1e-5) * g + b

    for p in params_list:
        qkv = x @ p["in_w"].T + p["in_b"][0]
        q = (qkv[..., :E] / jnp.sqrt(Dh)).reshape(B, S, H, Dh)
        k = qkv[..., E:2 * E].reshape(B, S, H, Dh)
        v = qkv[..., 2 * E:].reshape(B, S, H, Dh)
        s = jnp.einsum("bqhd,bkhd->bhqk", q, k)
        s = jnp.where(mask[:, None, None, :], -jnp.inf, s)
        pr = jax.nn.softmax(s, axis=-1)
        o = jnp.einsum("bhqk,bkhd->bqhd", pr, v).reshape(B, S, E)
        o = o @ p["out_w"].T + p["out_b"][0]
        src = ln(x + o, p["g1"][0], p["be1"][0])
        ff = jnp.maximum(src @ p["w1"].T + p["b1"][0], 0.0) @ p["w2"].T + p["b2"][0]
        x = ln(src + ff, p["g2"][0], p["be2"][0])
        ws.append(pr.mean(axis=1))
    return jnp.transpose(x, (1, 0, 2)), jnp.stack(ws, 0)


# -----------------------------------------------------------------------------
# Deterministic parameter init (shapes follow the PyTorch encoder layer).
# -----------------------------------------------------------------------------
def init_layer_params(key, E, F):
    ks = jax.random.split(key, 8)
    s = 0.05
    return dict(
        in_w=jax.random.normal(ks[0], (3 * E, E), jnp.float32) * s,
        in_b=jax.random.normal(ks[1], (1, 3 * E), jnp.float32) * s,
        out_w=jax.random.normal(ks[2], (E, E), jnp.float32) * s,
        out_b=jax.random.normal(ks[3], (1, E), jnp.float32) * s,
        w1=jax.random.normal(ks[4], (F, E), jnp.float32) * s,
        b1=jax.random.normal(ks[5], (1, F), jnp.float32) * s,
        w2=jax.random.normal(ks[6], (E, F), jnp.float32) * s,
        b2=jax.random.normal(ks[7], (1, E), jnp.float32) * s,
        g1=jnp.ones((1, E), jnp.float32), be1=jnp.zeros((1, E), jnp.float32),
        g2=jnp.ones((1, E), jnp.float32), be2=jnp.zeros((1, E), jnp.float32),
    )


if __name__ == "__main__":
    S, B, E, H, F, L = 8, 2, 32, 4, 64, 2

    key = jax.random.PRNGKey(0)
    k_x, k_params = jax.random.split(key)
    x = jax.random.normal(k_x, (S, B, E), jnp.float32)               # (seq, batch, embed)

    # key_padding_mask: True == padded position (ignored as attention key)
    key_padding_mask = jnp.zeros((B, S), dtype=bool).at[1, 5:].set(True)

    layer_keys = jax.random.split(k_params, L)
    params_list = [init_layer_params(layer_keys[i], E, F) for i in range(L)]

    # one-time weight prep (head split / transpose / scale-fold / pad / bf16 cast)
    prepared = prepare_encoder_params(params_list, H)

    out, weights = transformer_encoder_forward(x, key_padding_mask, prepared, H)
    out, weights = jax.block_until_ready((out, weights))

    # sanity check against a pure-f32 JAX reference (bf16 MXU path => loose tol)
    ref_out, ref_w = _ref_forward(x, key_padding_mask, params_list, H)
    assert out.shape == (S, B, E)
    assert weights.shape == (L, B, S, S)
    assert jnp.allclose(out, ref_out, atol=3e-2, rtol=3e-2), "output mismatch"
    assert jnp.allclose(weights, ref_w, atol=3e-2, rtol=3e-2), "attn weights mismatch"

    print("KERNEL_OK")
</pallas_src>

<mosaic_0001>
module attributes {stable_mosaic.version = 11 : i64} {
  func.func @_probe(%arg0: i32, %arg1: memref<8x128xf32, #tpu.memory_space<vmem>>, %arg2: memref<8x128xf32, #tpu.memory_space<vmem>>) attributes {dimension_semantics = [#tpu.dimension_semantics<arbitrary>], iteration_bounds = array<i64: 2>, scalar_prefetch = 0 : i64, scratch_operands = 0 : i64, tpu.core_type = #tpu.core_type<tc>, window_params = [{pipeline_mode = #tpu.pipeline_mode<synchronous>, transform_indices = @transform_0, window_bounds = array<i64: 8, 128>}, {pipeline_mode = #tpu.pipeline_mode<synchronous>, transform_indices = @transform_1, window_bounds = array<i64: 8, 128>}]} {
    %c0 = arith.constant 0 : index
    %c0_0 = arith.constant 0 : index
    %0 = vector.load %arg1[%c0, %c0_0] : memref<8x128xf32, #tpu.memory_space<vmem>>, vector<8x128xf32>
    %c0_1 = arith.constant 0 : index
    %c0_2 = arith.constant 0 : index
    %1 = vector.load %arg2[%c0_1, %c0_2] : memref<8x128xf32, #tpu.memory_space<vmem>>, vector<8x128xf32>
    tpu.vector_store %arg2[%c0_1, %c0_2], %0 {strides = array<i32>} : memref<8x128xf32, #tpu.memory_space<vmem>>, vector<8x128xf32>,
    return
  }
  func.func @transform_0(%arg0: i32) -> (i32, i32) {
    %c0_i32 = arith.constant 0 : i32
    %c0_i32_0 = arith.constant 0 : i32
    %c0_i32_1 = arith.constant 0 : i32
    return %c0_i32, %c0_i32_0 : i32, i32
  }
  func.func @transform_1(%arg0: i32) -> (i32, i32) {
    %c0_i32 = arith.constant 0 : i32
    %c0_i32_0 = arith.constant 0 : i32
    %c0_i32_1 = arith.constant 0 : i32
    return %c0_i32, %c0_i32_0 : i32, i32
  }
}

module attributes {stable_mosaic.version = 11 : i64} {
  func.func @_encoder_layer_kernel(%arg0: i32, %arg1: i32, %arg2: memref<1x8x128xf32, #tpu.memory_space<vmem>>, %arg3: memref<1x1x8xf32, #tpu.memory_space<vmem>>, %arg4: memref<4x128x8xbf16, #tpu.memory_space<vmem>>, %arg5: memref<4x1x8xf32, #tpu.memory_space<vmem>>, %arg6: memref<4x128x8xbf16, #tpu.memory_space<vmem>>, %arg7: memref<4x1x8xf32, #tpu.memory_space<vmem>>, %arg8: memref<4x128x8xbf16, #tpu.memory_space<vmem>>, %arg9: memref<4x1x8xf32, #tpu.memory_space<vmem>>, %arg10: memref<4x8x128xbf16, #tpu.memory_space<vmem>>, %arg11: memref<1x128xf32, #tpu.memory_space<vmem>>, %arg12: memref<128x128xbf16, #tpu.memory_space<vmem>>, %arg13: memref<1x128xf32, #tpu.memory_space<vmem>>, %arg14: memref<128x128xbf16, #tpu.memory_space<vmem>>, %arg15: memref<1x128xf32, #tpu.memory_space<vmem>>, %arg16: memref<1x128xf32, #tpu.memory_space<vmem>>, %arg17: memref<1x128xf32, #tpu.memory_space<vmem>>, %arg18: memref<1x128xf32, #tpu.memory_space<vmem>>, %arg19: memref<1x128xf32, #tpu.memory_space<vmem>>, %arg20: memref<1x8x128xf32, #tpu.memory_space<vmem>>, %arg21: memref<1x8x8xf32, #tpu.memory_space<vmem>>, %arg22: memref<4x8x8xbf16, #tpu.memory_space<vmem>>, %arg23: memref<4x8x8xbf16, #tpu.memory_space<vmem>>) attributes {dimension_semantics = [#tpu.dimension_semantics<parallel>, #tpu.dimension_semantics<arbitrary>], iteration_bounds = array<i64: 2, 1>, scalar_prefetch = 0 : i64, scratch_operands = 2 : i64, tpu.core_type = #tpu.core_type<tc>, window_params = [{transform_indices = @transform_0, window_bounds = array<i64: 1, 8, 128>}, {transform_indices = @transform_1, window_bounds = array<i64: 1, 1, 8>}, {pipeline_mode = #tpu.pipeline_mode<synchronous>, transform_indices = @transform_2, window_bounds = array<i64: 4, 128, 8>}, {pipeline_mode = #tpu.pipeline_mode<synchronous>, transform_indices = @transform_3, window_bounds = array<i64: 4, 1, 8>}, {pipeline_mode = #tpu.pipeline_mode<synchronous>, transform_indices = @transform_4, window_bounds = array<i64: 4, 128, 8>}, {pipeline_mode = #tpu.pipeline_mode<synchronous>, transform_indices = @transform_5, window_bounds = array<i64: 4, 1, 8>}, {pipeline_mode = #tpu.pipeline_mode<synchronous>, transform_indices = @transform_6, window_bounds = array<i64: 4, 128, 8>}, {pipeline_mode = #tpu.pipeline_mode<synchronous>, transform_indices = @transform_7, window_bounds = array<i64: 4, 1, 8>}, {pipeline_mode = #tpu.pipeline_mode<synchronous>, transform_indices = @transform_8, window_bounds = array<i64: 4, 8, 128>}, {pipeline_mode = #tpu.pipeline_mode<synchronous>, transform_indices = @transform_9, window_bounds = array<i64: 1, 128>}, {pipeline_mode = #tpu.pipeline_mode<synchronous>, transform_indices = @transform_10, window_bounds = array<i64: 128, 128>}, {pipeline_mode = #tpu.pipeline_mode<synchronous>, transform_indices = @transform_11, window_bounds = array<i64: 1, 128>}, {pipeline_mode = #tpu.pipeline_mode<synchronous>, transform_indices = @transform_12, window_bounds = array<i64: 128, 128>}, {pipeline_mode = #tpu.pipeline_mode<synchronous>, transform_indices = @transform_13, window_bounds = array<i64: 1, 128>}, {pipeline_mode = #tpu.pipeline_mode<synchronous>, transform_indices = @transform_14, window_bounds = array<i64: 1, 128>}, {pipeline_mode = #tpu.pipeline_mode<synchronous>, transform_indices = @transform_15, window_bounds = array<i64: 1, 128>}, {pipeline_mode = #tpu.pipeline_mode<synchronous>, transform_indices = @transform_16, window_bounds = array<i64: 1, 128>}, {pipeline_mode = #tpu.pipeline_mode<synchronous>, transform_indices = @transform_17, window_bounds = array<i64: 1, 128>}, {transform_indices = @transform_18, window_bounds = array<i64: 1, 8, 128>}, {transform_indices = @transform_19, window_bounds = array<i64: 1, 8, 8>}]} {
    %c0_i32 = arith.constant 0 : i32
    %0 = arith.cmpi eq, %arg1, %c0_i32 : i32
    %1 = arith.extui %0 : i1 to i32
    %c0_i32_0 = arith.constant 0 : i32
    %2 = arith.cmpi ne, %1, %c0_i32_0 : i32
    scf.if %2 {
      %c0_71 = arith.constant 0 : index
      %c0_72 = arith.constant 0 : index
      %c0_73 = arith.constant 0 : index
      %128 = vector.load %arg2[%c0_71, %c0_72, %c0_73] : memref<1x8x128xf32, #tpu.memory_space<vmem>>, vector<1x8x128xf32>
      %129 = vector.shape_cast %128 : vector<1x8x128xf32> to vector<8x128xf32>
      %130 = arith.truncf %129 : vector<8x128xf32> to vector<8x128xbf16>
      %131 = vector.shape_cast %130 : vector<8x128xbf16> to vector<1x8x128xbf16>
      %132 = vector.shape_cast %131 : vector<1x8x128xbf16> to vector<1x8x128xbf16>
      %133 = vector.broadcast %132 : vector<1x8x128xbf16> to vector<4x8x128xbf16>
      %c0_74 = arith.constant 0 : index
      %c0_75 = arith.constant 0 : index
      %c0_76 = arith.constant 0 : index
      %134 = vector.load %arg6[%c0_74, %c0_75, %c0_76] : memref<4x128x8xbf16, #tpu.memory_space<vmem>>, vector<4x128x8xbf16>
      "tpu.trace_start"() <{level = 10 : i32, message = "hse,hed->hsd"}> : () -> ()
      %cst_77 = arith.constant dense<0.000000e+00> : vector<4x8x8xf32>
      %135 = tpu.matmul %133, %134, %cst_77 {dimension_numbers = #tpu.dot_dimension_numbers<[2], [1], [1], [2], [0, 0, 0, 1, 1, 2], [0], [0]>} : vector<4x8x128xbf16>, vector<4x128x8xbf16>, vector<4x8x8xf32> -> vector<4x8x8xf32>
      "tpu.trace_stop"() : () -> ()
      %c0_78 = arith.constant 0 : index
      %c0_79 = arith.constant 0 : index
      %c0_80 = arith.constant 0 : index
      %136 = vector.load %arg7[%c0_78, %c0_79, %c0_80] : memref<4x1x8xf32, #tpu.memory_space<vmem>>, vector<4x1x8xf32>
      %137 = vector.broadcast %136 : vector<4x1x8xf32> to vector<4x8x8xf32>
      %138 = arith.addf %135, %137 : vector<4x8x8xf32>
      %c0_81 = arith.constant 0 : index
      %c0_82 = arith.constant 0 : index
      %c0_83 = arith.constant 0 : index
      %139 = vector.load %arg8[%c0_81, %c0_82, %c0_83] : memref<4x128x8xbf16, #tpu.memory_space<vmem>>, vector<4x128x8xbf16>
      "tpu.trace_start"() <{level = 10 : i32, message = "hse,hed->hsd"}> : () -> ()
      %cst_84 = arith.constant dense<0.000000e+00> : vector<4x8x8xf32>
      %140 = tpu.matmul %133, %139, %cst_84 {dimension_numbers = #tpu.dot_dimension_numbers<[2], [1], [1], [2], [0, 0, 0, 1, 1, 2], [0], [0]>} : vector<4x8x128xbf16>, vector<4x128x8xbf16>, vector<4x8x8xf32> -> vector<4x8x8xf32>
      "tpu.trace_stop"() : () -> ()
      %c0_85 = arith.constant 0 : index
      %c0_86 = arith.constant 0 : index
      %c0_87 = arith.constant 0 : index
      %141 = vector.load %arg9[%c0_85, %c0_86, %c0_87] : memref<4x1x8xf32, #tpu.memory_space<vmem>>, vector<4x1x8xf32>
      %142 = vector.broadcast %141 : vector<4x1x8xf32> to vector<4x8x8xf32>
      %143 = arith.addf %140, %142 : vector<4x8x8xf32>
      %144 = arith.truncf %138 : vector<4x8x8xf32> to vector<4x8x8xbf16>
      %c0_88 = arith.constant 0 : index
      %c0_89 = arith.constant 0 : index
      %c0_90 = arith.constant 0 : index
      %145 = vector.load %arg22[%c0_88, %c0_89, %c0_90] : memref<4x8x8xbf16, #tpu.memory_space<vmem>>, vector<4x8x8xbf16>
      tpu.vector_store %arg22[%c0_88, %c0_89, %c0_90], %144 {strides = array<i32>} : memref<4x8x8xbf16, #tpu.memory_space<vmem>>, vector<4x8x8xbf16>,
      %146 = arith.truncf %143 : vector<4x8x8xf32> to vector<4x8x8xbf16>
      %c0_91 = arith.constant 0 : index
      %c0_92 = arith.constant 0 : index
      %c0_93 = arith.constant 0 : index
      %147 = vector.load %arg23[%c0_91, %c0_92, %c0_93] : memref<4x8x8xbf16, #tpu.memory_space<vmem>>, vector<4x8x8xbf16>
      tpu.vector_store %arg23[%c0_91, %c0_92, %c0_93], %146 {strides = array<i32>} : memref<4x8x8xbf16, #tpu.memory_space<vmem>>, vector<4x8x8xbf16>,
    } else {
    }
    %c8_i32 = arith.constant 8 : i32
    %3 = arith.muli %arg1, %c8_i32 : i32
    %4 = tpu.assume_multiple %3, 8 : i32
    %c0 = arith.constant 0 : index
    %5 = arith.index_cast %4 : i32 to index
    %c0_1 = arith.constant 0 : index
    %6 = vector.load %arg2[%c0, %5, %c0_1] : memref<1x8x128xf32, #tpu.memory_space<vmem>>, vector<1x8x128xf32>
    %7 = vector.shape_cast %6 : vector<1x8x128xf32> to vector<8x128xf32>
    %8 = arith.truncf %7 : vector<8x128xf32> to vector<8x128xbf16>
    %9 = vector.shape_cast %8 : vector<8x128xbf16> to vector<1x8x128xbf16>
    %10 = vector.shape_cast %9 : vector<1x8x128xbf16> to vector<1x8x128xbf16>
    %11 = vector.broadcast %10 : vector<1x8x128xbf16> to vector<4x8x128xbf16>
    %c0_2 = arith.constant 0 : index
    %c0_3 = arith.constant 0 : index
    %c0_4 = arith.constant 0 : index
    %12 = vector.load %arg4[%c0_2, %c0_3, %c0_4] : memref<4x128x8xbf16, #tpu.memory_space<vmem>>, vector<4x128x8xbf16>
    "tpu.trace_start"() <{level = 10 : i32, message = "hqe,hed->hqd"}> : () -> ()
    %cst = arith.constant dense<0.000000e+00> : vector<4x8x8xf32>
    %13 = tpu.matmul %11, %12, %cst {dimension_numbers = #tpu.dot_dimension_numbers<[2], [1], [1], [2], [0, 0, 0, 1, 1, 2], [0], [0]>} : vector<4x8x128xbf16>, vector<4x128x8xbf16>, vector<4x8x8xf32> -> vector<4x8x8xf32>
    "tpu.trace_stop"() : () -> ()
    %c0_5 = arith.constant 0 : index
    %c0_6 = arith.constant 0 : index
    %c0_7 = arith.constant 0 : index
    %14 = vector.load %arg5[%c0_5, %c0_6, %c0_7] : memref<4x1x8xf32, #tpu.memory_space<vmem>>, vector<4x1x8xf32>
    %15 = vector.broadcast %14 : vector<4x1x8xf32> to vector<4x8x8xf32>
    %16 = arith.addf %13, %15 : vector<4x8x8xf32>
    %17 = arith.truncf %16 : vector<4x8x8xf32> to vector<4x8x8xbf16>
    %c0_8 = arith.constant 0 : index
    %c0_9 = arith.constant 0 : index
    %c0_10 = arith.constant 0 : index
    %18 = vector.load %arg3[%c0_8, %c0_9, %c0_10] : memref<1x1x8xf32, #tpu.memory_space<vmem>>, vector<1x1x8xf32>
    %19 = vector.shape_cast %18 : vector<1x1x8xf32> to vector<1x8xf32>
    %cst_11 = arith.constant 5.000000e-01 : f32
    %20 = vector.broadcast %cst_11 : f32 to vector<1x8xf32>
    %21 = arith.cmpf ogt, %19, %20 : vector<1x8xf32>
    %cst_12 = arith.constant 0xFF800000 : f32
    %cst_13 = arith.constant 0.000000e+00 : f32
    %22 = vector.broadcast %cst_12 : f32 to vector<1x8xf32>
    %23 = vector.broadcast %cst_13 : f32 to vector<1x8xf32>
    %24 = arith.select %21, %22, %23 : vector<1x8xi1>, vector<1x8xf32>
    %c0_14 = arith.constant 0 : index
    %c0_15 = arith.constant 0 : index
    %c0_16 = arith.constant 0 : index
    %25 = vector.load %arg22[%c0_14, %c0_15, %c0_16] : memref<4x8x8xbf16, #tpu.memory_space<vmem>>, vector<4x8x8xbf16>
    "tpu.trace_start"() <{level = 10 : i32, message = "hqd,hkd->hqk"}> : () -> ()
    %cst_17 = arith.constant dense<0.000000e+00> : vector<4x8x8xf32>
    %26 = tpu.matmul %17, %25, %cst_17 {dimension_numbers = #tpu.dot_dimension_numbers<[2], [2], [1], [1], [0, 0, 0, 1, 1, 1], [0], [0]>} : vector<4x8x8xbf16>, vector<4x8x8xbf16>, vector<4x8x8xf32> -> vector<4x8x8xf32>
    "tpu.trace_stop"() : () -> ()
    %27 = vector.shape_cast %24 : vector<1x8xf32> to vector<1x1x8xf32>
    %28 = vector.broadcast %27 : vector<1x1x8xf32> to vector<4x8x8xf32>
    %29 = arith.addf %26, %28 : vector<4x8x8xf32>
    %cst_18 = arith.constant dense<0xFF800000> : vector<4x8xf32>
    %30 = vector.multi_reduction <maximumf>, %29, %cst_18 [2] : vector<4x8x8xf32> to vector<4x8xf32>
    %31 = vector.shape_cast %30 : vector<4x8xf32> to vector<4x8x1xf32>
    %32 = vector.broadcast %31 : vector<4x8x1xf32> to vector<4x8x8xf32>
    %33 = arith.subf %29, %32 : vector<4x8x8xf32>
    %34 = math.exp %33 : vector<4x8x8xf32>
    %cst_19 = arith.constant dense<0.000000e+00> : vector<4x8xf32>
    %35 = vector.multi_reduction <add>, %34, %cst_19 [2] : vector<4x8x8xf32> to vector<4x8xf32>
    %36 = vector.shape_cast %35 : vector<4x8xf32> to vector<4x8x1xf32>
    %cst_20 = arith.constant 1.000000e+00 : f32
    %37 = vector.broadcast %cst_20 : f32 to vector<4x8x1xf32>
    %38 = arith.divf %37, %36 : vector<4x8x1xf32>
    %39 = vector.broadcast %38 : vector<4x8x1xf32> to vector<4x8x8xf32>
    %40 = arith.mulf %34, %39 : vector<4x8x8xf32>
    %cst_21 = arith.constant dense<0.000000e+00> : vector<8x8xf32>
    %41 = vector.multi_reduction <add>, %40, %cst_21 [0] : vector<4x8x8xf32> to vector<8x8xf32>
    %cst_22 = arith.constant 2.500000e-01 : f32
    %42 = vector.broadcast %cst_22 : f32 to vector<8x8xf32>
    %43 = arith.mulf %41, %42 : vector<8x8xf32>
    %c0_23 = arith.constant 0 : index
    %c0_24 = arith.constant 0 : index
    %c0_25 = arith.constant 0 : index
    %44 = vector.load %arg21[%c0_23, %c0_24, %c0_25] : memref<1x8x8xf32, #tpu.memory_space<vmem>>, vector<1x8x8xf32>
    %45 = vector.shape_cast %44 : vector<1x8x8xf32> to vector<8x8xf32>
    %46 = vector.shape_cast %43 : vector<8x8xf32> to vector<1x8x8xf32>
    tpu.vector_store %arg21[%c0_23, %c0_24, %c0_25], %46 {strides = array<i32>} : memref<1x8x8xf32, #tpu.memory_space<vmem>>, vector<1x8x8xf32>,
    %47 = arith.truncf %40 : vector<4x8x8xf32> to vector<4x8x8xbf16>
    %c0_26 = arith.constant 0 : index
    %c0_27 = arith.constant 0 : index
    %c0_28 = arith.constant 0 : index
    %48 = vector.load %arg23[%c0_26, %c0_27, %c0_28] : memref<4x8x8xbf16, #tpu.memory_space<vmem>>, vector<4x8x8xbf16>
    "tpu.trace_start"() <{level = 10 : i32, message = "hqk,hkd->hqd"}> : () -> ()
    %cst_29 = arith.constant dense<0.000000e+00> : vector<4x8x8xf32>
    %49 = tpu.matmul %47, %48, %cst_29 {dimension_numbers = #tpu.dot_dimension_numbers<[2], [1], [1], [2], [0, 0, 0, 1, 1, 2], [0], [0]>} : vector<4x8x8xbf16>, vector<4x8x8xbf16>, vector<4x8x8xf32> -> vector<4x8x8xf32>
    "tpu.trace_stop"() : () -> ()
    %50 = arith.truncf %49 : vector<4x8x8xf32> to vector<4x8x8xbf16>
    %c0_30 = arith.constant 0 : index
    %c0_31 = arith.constant 0 : index
    %c0_32 = arith.constant 0 : index
    %51 = vector.load %arg10[%c0_30, %c0_31, %c0_32] : memref<4x8x128xbf16, #tpu.memory_space<vmem>>, vector<4x8x128xbf16>
    "tpu.trace_start"() <{level = 10 : i32, message = "hqd,hde->hqe"}> : () -> ()
    %cst_33 = arith.constant dense<0.000000e+00> : vector<4x8x128xf32>
    %52 = tpu.matmul %50, %51, %cst_33 {dimension_numbers = #tpu.dot_dimension_numbers<[2], [1], [1], [2], [0, 0, 0, 1, 1, 2], [0], [0]>} : vector<4x8x8xbf16>, vector<4x8x128xbf16>, vector<4x8x128xf32> -> vector<4x8x128xf32>
    "tpu.trace_stop"() : () -> ()
    %cst_34 = arith.constant dense<0.000000e+00> : vector<8x128xf32>
    %53 = vector.multi_reduction <add>, %52, %cst_34 [0] : vector<4x8x128xf32> to vector<8x128xf32>
    %c0_35 = arith.constant 0 : index
    %c0_36 = arith.constant 0 : index
    %54 = vector.load %arg11[%c0_35, %c0_36] : memref<1x128xf32, #tpu.memory_space<vmem>>, vector<1x128xf32>
    %55 = vector.broadcast %54 : vector<1x128xf32> to vector<8x128xf32>
    %56 = arith.addf %53, %55 : vector<8x128xf32>
    %57 = arith.addf %7, %56 : vector<8x128xf32>
    %c0_37 = arith.constant 0 : index
    %c0_38 = arith.constant 0 : index
    %58 = vector.load %arg16[%c0_37, %c0_38] : memref<1x128xf32, #tpu.memory_space<vmem>>, vector<1x128xf32>
    %c0_39 = arith.constant 0 : index
    %c0_40 = arith.constant 0 : index
    %59 = vector.load %arg17[%c0_39, %c0_40] : memref<1x128xf32, #tpu.memory_space<vmem>>, vector<1x128xf32>
    %cst_41 = arith.constant dense<0.000000e+00> : vector<8xf32>
    %60 = vector.multi_reduction <add>, %57, %cst_41 [1] : vector<8x128xf32> to vector<8xf32>
    %61 = vector.shape_cast %60 : vector<8xf32> to vector<8x1xf32>
    %cst_42 = arith.constant 3.125000e-02 : f32
    %62 = vector.broadcast %cst_42 : f32 to vector<8x1xf32>
    %63 = arith.mulf %61, %62 : vector<8x1xf32>
    %64 = vector.broadcast %63 : vector<8x1xf32> to vector<8x128xf32>
    %65 = arith.subf %57, %64 : vector<8x128xf32>
    %66 = arith.mulf %65, %65 : vector<8x128xf32>
    %cst_43 = arith.constant dense<0.000000e+00> : vector<8xf32>
    %67 = vector.multi_reduction <add>, %66, %cst_43 [1] : vector<8x128xf32> to vector<8xf32>
    %68 = vector.shape_cast %67 : vector<8xf32> to vector<8x1xf32>
    %cst_44 = arith.constant 9.600000e+01 : f32
    %69 = vector.broadcast %cst_44 : f32 to vector<8x1xf32>
    %70 = arith.mulf %69, %63 : vector<8x1xf32>
    %71 = arith.mulf %70, %63 : vector<8x1xf32>
    %72 = arith.subf %68, %71 : vector<8x1xf32>
    %cst_45 = arith.constant 3.125000e-02 : f32
    %73 = vector.broadcast %cst_45 : f32 to vector<8x1xf32>
    %74 = arith.mulf %72, %73 : vector<8x1xf32>
    %cst_46 = arith.constant 9.99999974E-6 : f32
    %75 = vector.broadcast %cst_46 : f32 to vector<8x1xf32>
    %76 = arith.addf %74, %75 : vector<8x1xf32>
    %77 = math.rsqrt %76 : vector<8x1xf32>
    %78 = vector.broadcast %77 : vector<8x1xf32> to vector<8x128xf32>
    %79 = arith.mulf %65, %78 : vector<8x128xf32>
    %80 = vector.broadcast %58 : vector<1x128xf32> to vector<8x128xf32>
    %81 = arith.mulf %79, %80 : vector<8x128xf32>
    %82 = vector.broadcast %59 : vector<1x128xf32> to vector<8x128xf32>
    %83 = arith.addf %81, %82 : vector<8x128xf32>
    %84 = arith.truncf %83 : vector<8x128xf32> to vector<8x128xbf16>
    %c0_47 = arith.constant 0 : index
    %c0_48 = arith.constant 0 : index
    %85 = vector.load %arg12[%c0_47, %c0_48] : memref<128x128xbf16, #tpu.memory_space<vmem>>, vector<128x128xbf16>
    %cst_49 = arith.constant dense<0.000000e+00> : vector<8x128xf32>
    %86 = tpu.matmul %84, %85, %cst_49 {dimension_numbers = #tpu.dot_dimension_numbers<[1], [0], [0], [1], [0, 0, 1, 1], [], []>} : vector<8x128xbf16>, vector<128x128xbf16>, vector<8x128xf32> -> vector<8x128xf32>
    %c0_50 = arith.constant 0 : index
    %c0_51 = arith.constant 0 : index
    %87 = vector.load %arg13[%c0_50, %c0_51] : memref<1x128xf32, #tpu.memory_space<vmem>>, vector<1x128xf32>
    %88 = vector.broadcast %87 : vector<1x128xf32> to vector<8x128xf32>
    %89 = arith.addf %86, %88 : vector<8x128xf32>
    %cst_52 = arith.constant 0.000000e+00 : f32
    %90 = vector.broadcast %cst_52 : f32 to vector<8x128xf32>
    %91 = arith.maximumf %89, %90 : vector<8x128xf32>
    %92 = arith.truncf %91 : vector<8x128xf32> to vector<8x128xbf16>
    %c0_53 = arith.constant 0 : index
    %c0_54 = arith.constant 0 : index
    %93 = vector.load %arg14[%c0_53, %c0_54] : memref<128x128xbf16, #tpu.memory_space<vmem>>, vector<128x128xbf16>
    %cst_55 = arith.constant dense<0.000000e+00> : vector<8x128xf32>
    %94 = tpu.matmul %92, %93, %cst_55 {dimension_numbers = #tpu.dot_dimension_numbers<[1], [0], [0], [1], [0, 0, 1, 1], [], []>} : vector<8x128xbf16>, vector<128x128xbf16>, vector<8x128xf32> -> vector<8x128xf32>
    %c0_56 = arith.constant 0 : index
    %c0_57 = arith.constant 0 : index
    %95 = vector.load %arg15[%c0_56, %c0_57] : memref<1x128xf32, #tpu.memory_space<vmem>>, vector<1x128xf32>
    %96 = vector.broadcast %95 : vector<1x128xf32> to vector<8x128xf32>
    %97 = arith.addf %94, %96 : vector<8x128xf32>
    %98 = arith.addf %83, %97 : vector<8x128xf32>
    %c0_58 = arith.constant 0 : index
    %c0_59 = arith.constant 0 : index
    %99 = vector.load %arg18[%c0_58, %c0_59] : memref<1x128xf32, #tpu.memory_space<vmem>>, vector<1x128xf32>
    %c0_60 = arith.constant 0 : index
    %c0_61 = arith.constant 0 : index
    %100 = vector.load %arg19[%c0_60, %c0_61] : memref<1x128xf32, #tpu.memory_space<vmem>>, vector<1x128xf32>
    %cst_62 = arith.constant dense<0.000000e+00> : vector<8xf32>
    %101 = vector.multi_reduction <add>, %98, %cst_62 [1] : vector<8x128xf32> to vector<8xf32>
    %102 = vector.shape_cast %101 : vector<8xf32> to vector<8x1xf32>
    %cst_63 = arith.constant 3.125000e-02 : f32
    %103 = vector.broadcast %cst_63 : f32 to vector<8x1xf32>
    %104 = arith.mulf %102, %103 : vector<8x1xf32>
    %105 = vector.broadcast %104 : vector<8x1xf32> to vector<8x128xf32>
    %106 = arith.subf %98, %105 : vector<8x128xf32>
    %107 = arith.mulf %106, %106 : vector<8x128xf32>
    %cst_64 = arith.constant dense<0.000000e+00> : vector<8xf32>
    %108 = vector.multi_reduction <add>, %107, %cst_64 [1] : vector<8x128xf32> to vector<8xf32>
    %109 = vector.shape_cast %108 : vector<8xf32> to vector<8x1xf32>
    %cst_65 = arith.constant 9.600000e+01 : f32
    %110 = vector.broadcast %cst_65 : f32 to vector<8x1xf32>
    %111 = arith.mulf %110, %104 : vector<8x1xf32>
    %112 = arith.mulf %111, %104 : vector<8x1xf32>
    %113 = arith.subf %109, %112 : vector<8x1xf32>
    %cst_66 = arith.constant 3.125000e-02 : f32
    %114 = vector.broadcast %cst_66 : f32 to vector<8x1xf32>
    %115 = arith.mulf %113, %114 : vector<8x1xf32>
    %cst_67 = arith.constant 9.99999974E-6 : f32
    %116 = vector.broadcast %cst_67 : f32 to vector<8x1xf32>
    %117 = arith.addf %115, %116 : vector<8x1xf32>
    %118 = math.rsqrt %117 : vector<8x1xf32>
    %119 = vector.broadcast %118 : vector<8x1xf32> to vector<8x128xf32>
    %120 = arith.mulf %106, %119 : vector<8x128xf32>
    %121 = vector.broadcast %99 : vector<1x128xf32> to vector<8x128xf32>
    %122 = arith.mulf %120, %121 : vector<8x128xf32>
    %123 = vector.broadcast %100 : vector<1x128xf32> to vector<8x128xf32>
    %124 = arith.addf %122, %123 : vector<8x128xf32>
    %c0_68 = arith.constant 0 : index
    %c0_69 = arith.constant 0 : index
    %c0_70 = arith.constant 0 : index
    %125 = vector.load %arg20[%c0_68, %c0_69, %c0_70] : memref<1x8x128xf32, #tpu.memory_space<vmem>>, vector<1x8x128xf32>
    %126 = vector.shape_cast %125 : vector<1x8x128xf32> to vector<8x128xf32>
    %127 = vector.shape_cast %124 : vector<8x128xf32> to vector<1x8x128xf32>
    tpu.vector_store %arg20[%c0_68, %c0_69, %c0_70], %127 {strides = array<i32>} : memref<1x8x128xf32, #tpu.memory_space<vmem>>, vector<1x8x128xf32>,
    return
  }
  func.func @transform_0(%arg0: i32, %arg1: i32) -> (i32, i32, i32) {
    %c0_i32 = arith.constant 0 : i32
    %c0_i32_0 = arith.constant 0 : i32
    %c0_i32_1 = arith.constant 0 : i32
    return %arg0, %c0_i32, %c0_i32_0 : i32, i32, i32
  }
  func.func @transform_1(%arg0: i32, %arg1: i32) -> (i32, i32, i32) {
    %c0_i32 = arith.constant 0 : i32
    %c0_i32_0 = arith.constant 0 : i32
    %c0_i32_1 = arith.constant 0 : i32
    return %arg0, %c0_i32, %c0_i32_0 : i32, i32, i32
  }
  func.func @transform_2(%arg0: i32, %arg1: i32) -> (i32, i32, i32) {
    %c0_i32 = arith.constant 0 : i32
    %c0_i32_0 = arith.constant 0 : i32
    %c0_i32_1 = arith.constant 0 : i32
    %c0_i32_2 = arith.constant 0 : i32
    return %c0_i32, %c0_i32_0, %c0_i32_1 : i32, i32, i32
  }
  func.func @transform_3(%arg0: i32, %arg1: i32) -> (i32, i32, i32) {
    %c0_i32 = arith.constant 0 : i32
    %c0_i32_0 = arith.constant 0 : i32
    %c0_i32_1 = arith.constant 0 : i32
    %c0_i32_2 = arith.constant 0 : i32
    return %c0_i32, %c0_i32_0, %c0_i32_1 : i32, i32, i32
  }
  func.func @transform_4(%arg0: i32, %arg1: i32) -> (i32, i32, i32) {
    %c0_i32 = arith.constant 0 : i32
    %c0_i32_0 = arith.constant 0 : i32
    %c0_i32_1 = arith.constant 0 : i32
    %c0_i32_2 = arith.constant 0 : i32
    return %c0_i32, %c0_i32_0, %c0_i32_1 : i32, i32, i32
  }
  func.func @transform_5(%arg0: i32, %arg1: i32) -> (i32, i32, i32) {
    %c0_i32 = arith.constant 0 : i32
    %c0_i32_0 = arith.constant 0 : i32
    %c0_i32_1 = arith.constant 0 : i32
    %c0_i32_2 = arith.constant 0 : i32
    return %c0_i32, %c0_i32_0, %c0_i32_1 : i32, i32, i32
  }
  func.func @transform_6(%arg0: i32, %arg1: i32) -> (i32, i32, i32) {
    %c0_i32 = arith.constant 0 : i32
    %c0_i32_0 = arith.constant 0 : i32
    %c0_i32_1 = arith.constant 0 : i32
    %c0_i32_2 = arith.constant 0 : i32
    return %c0_i32, %c0_i32_0, %c0_i32_1 : i32, i32, i32
  }
  func.func @transform_7(%arg0: i32, %arg1: i32) -> (i32, i32, i32) {
    %c0_i32 = arith.constant 0 : i32
    %c0_i32_0 = arith.constant 0 : i32
    %c0_i32_1 = arith.constant 0 : i32
    %c0_i32_2 = arith.constant 0 : i32
    return %c0_i32, %c0_i32_0, %c0_i32_1 : i32, i32, i32
  }
  func.func @transform_8(%arg0: i32, %arg1: i32) -> (i32, i32, i32) {
    %c0_i32 = arith.constant 0 : i32
    %c0_i32_0 = arith.constant 0 : i32
    %c0_i32_1 = arith.constant 0 : i32
    %c0_i32_2 = arith.constant 0 : i32
    return %c0_i32, %c0_i32_0, %c0_i32_1 : i32, i32, i32
  }
  func.func @transform_9(%arg0: i32, %arg1: i32) -> (i32, i32) {
    %c0_i32 = arith.constant 0 : i32
    %c0_i32_0 = arith.constant 0 : i32
    %c0_i32_1 = arith.constant 0 : i32
    return %c0_i32, %c0_i32_0 : i32, i32
  }
  func.func @transform_10(%arg0: i32, %arg1: i32) -> (i32, i32) {
    %c0_i32 = arith.constant 0 : i32
    %c0_i32_0 = arith.constant 0 : i32
    %c0_i32_1 = arith.constant 0 : i32
    return %c0_i32, %c0_i32_0 : i32, i32
  }
  func.func @transform_11(%arg0: i32, %arg1: i32) -> (i32, i32) {
    %c0_i32 = arith.constant 0 : i32
    %c0_i32_0 = arith.constant 0 : i32
    %c0_i32_1 = arith.constant 0 : i32
    return %c0_i32, %c0_i32_0 : i32, i32
  }
  func.func @transform_12(%arg0: i32, %arg1: i32) -> (i32, i32) {
    %c0_i32 = arith.constant 0 : i32
    %c0_i32_0 = arith.constant 0 : i32
    %c0_i32_1 = arith.constant 0 : i32
    return %c0_i32, %c0_i32_0 : i32, i32
  }
  func.func @transform_13(%arg0: i32, %arg1: i32) -> (i32, i32) {
    %c0_i32 = arith.constant 0 : i32
    %c0_i32_0 = arith.constant 0 : i32
    %c0_i32_1 = arith.constant 0 : i32
    return %c0_i32, %c0_i32_0 : i32, i32
  }
  func.func @transform_14(%arg0: i32, %arg1: i32) -> (i32, i32) {
    %c0_i32 = arith.constant 0 : i32
    %c0_i32_0 = arith.constant 0 : i32
    %c0_i32_1 = arith.constant 0 : i32
    return %c0_i32, %c0_i32_0 : i32, i32
  }
  func.func @transform_15(%arg0: i32, %arg1: i32) -> (i32, i32) {
    %c0_i32 = arith.constant 0 : i32
    %c0_i32_0 = arith.constant 0 : i32
    %c0_i32_1 = arith.constant 0 : i32
    return %c0_i32, %c0_i32_0 : i32, i32
  }
  func.func @transform_16(%arg0: i32, %arg1: i32) -> (i32, i32) {
    %c0_i32 = arith.constant 0 : i32
    %c0_i32_0 = arith.constant 0 : i32
    %c0_i32_1 = arith.constant 0 : i32
    return %c0_i32, %c0_i32_0 : i32, i32
  }
  func.func @transform_17(%arg0: i32, %arg1: i32) -> (i32, i32) {
    %c0_i32 = arith.constant 0 : i32
    %c0_i32_0 = arith.constant 0 : i32
    %c0_i32_1 = arith.constant 0 : i32
    return %c0_i32, %c0_i32_0 : i32, i32
  }
  func.func @transform_18(%arg0: i32, %arg1: i32) -> (i32, i32, i32) {
    %c0_i32 = arith.constant 0 : i32
    %c0_i32_0 = arith.constant 0 : i32
    return %arg0, %arg1, %c0_i32 : i32, i32, i32
  }
  func.func @transform_19(%arg0: i32, %arg1: i32) -> (i32, i32, i32) {
    %c0_i32 = arith.constant 0 : i32
    %c0_i32_0 = arith.constant 0 : i32
    return %arg0, %arg1, %c0_i32 : i32, i32, i32
  }
}

</mosaic_0001>

<bundles_post_ra>
// kernel: tpu_custom_call.1
= control target key start
LH: loop header
LB: loop body
LE: loop exit
PB: predicated region body
PF: predicated region fallthrough
CT: control target
= control target key end

     0   :  { %6 = vsyncpa [#allocation3], 0  ;;  %s286_s0 = inlined_call_operand.hbm [shape: f32[8,128], index: 0, kind: input, shape index: {}]   ;;  %s287_s1 = inlined_call_operand.hbm [shape: f32[8,128], index: 1, kind: output, shape index: {}]  }
   0x1   :  { %7 = vsyncpa [#allocation4], 0  ;;  %s269_s6 = smov 0  }
   0x2 LB: > { %s148_s7 = sadd.s32 4294967295, %s255_s6   ;;  %p149_p0 = scmp.ge.s32.totalorder %s255_s6, 1  ;;  %s255_s6 = sphi %s269_s6, %s13_s6  }
   0x3   : > { %p60_p1 = scmp.lt.s32.totalorder %s255_s6, 3  ;;  %s72_s10 = sshll.u32 %s286_s0, 4  ;;  %s73_s10 = int_to_ptr.hbm [resolvable:$true] %s72_s10 }
   0x4   : > { %p169_p3 = scmp.eq.s32.totalorder %s148_s7, 0  ;;  %s257_s11 = smov [#allocation2]  }
   0x5   : > { %p61_p2 = pnand %p149_p0, %p60_p1  ;;  %s74_s12 = sshll.u32 %s257_s11, 4  ;;  %s75_s12 = int_to_ptr.vmem [resolvable:$true] %s74_s12 }
   0x7   : > { %p165_p4 = pneg %p61_p2  ;;  %87 = sbr.rel (%p61_p2) target bundleno = 19 (0x13), region = 24 }
   0x9   : > { %p166_p5 = pnand %p169_p3, %p165_p4 }
   0xb   : > { %168 = dma.hbm_to_vmem [thread:$0]  (!%p166_p5), %s73_s10, 128, %s75_s12, [#allocation3]  }
   0xc   : > { %246 = dma.done.wait (%p169_p3), [#allocation3], 128  }
   0xd   : > { %248 = vsyncadd (%p169_p3), [#allocation3], 4294967168  ;;  %s258_s13 = smov [#allocation5]   ;;  %s108_s17 = sshll.u32 %s287_s1, 4  ;;  %v98_v0 = vld [vmem:[#allocation2] sm:$0xff]  ;;  %s109_s17 = int_to_ptr.hbm [resolvable:$true] %s108_s17 }
   0xe   : > { %s106_s14 = sshll.u32 %s258_s13, 4  ;;  %p171_p6 = scmp.eq.s32.totalorder %s148_s7, 1  ;;  %99 = vst [vmem:[#allocation5] sm:$0xff] %v98_v0  ;;  %s107_s14 = int_to_ptr.vmem [resolvable:$true] %s106_s14 }
  0x10   : > { %162 = dma.vmem_to_hbm [thread:$0]  (%p171_p6), %s107_s14, 128, %s109_s17, [#allocation4]  }
  0x11   : > { %250 = dma.done.wait (%p171_p6), [#allocation4], 128  }
  0x12   : > { %252 = vsyncadd (%p171_p6), [#allocation4], 4294967168 }
  0x13 PF: > { %s13_s6 = sadd.s32 1, %s255_s6  }
  0x14   : > { %p10_p7 = scmp.ge.s32.totalorder %s13_s6, 4  }
  0x16   :  { %12 = sbr.rel (!%p10_p7) target bundleno = 2 (0x2), region = 53 }
  0x1b   :  { %122 = vsyncpa [#allocation3], 1 }
  0x1c   :  { %124 = vsyncpa [#allocation3 + $0x1], 1 }
  0x1d   :  { %125 = vsyncpa [#allocation4], 1 }
  0x1e   :  { %127 = vsyncpa [#allocation4 + $0x1], 1 }

// kernel: tpu_custom_call.1
= control target key start
LH: loop header
LB: loop body
LE: loop exit
PB: predicated region body
PF: predicated region fallthrough
CT: control target
= control target key end

     0   :  { %s3910_s0 = inlined_call_operand.vmem [shape: f32[2,8,128], index: 0, kind: input, shape index: {}]   ;;  %s3911_s1 = inlined_call_operand.vmem [shape: f32[2,1,8], index: 1, kind: input, shape index: {}]   ;;  %s3912_s2 = inlined_call_operand.vmem [shape: bf16[4,128,8], index: 2, kind: input, shape index: {}]   ;;  %s3913_s3 = inlined_call_operand.vmem [shape: f32[4,1,8], index: 3, kind: input, shape index: {}]   ;;  %s3914_s4 = inlined_call_operand.vmem [shape: bf16[4,128,8], index: 4, kind: input, shape index: {}]   ;;  %s3915_s5 = inlined_call_operand.vmem [shape: f32[4,1,8], index: 5, kind: input, shape index: {}]   ;;  %s3916_s6 = inlined_call_operand.vmem [shape: bf16[4,128,8], index: 6, kind: input, shape index: {}]   ;;  %s3917_s7 = inlined_call_operand.vmem [shape: f32[4,1,8], index: 7, kind: input, shape index: {}]   ;;  %s3918_s8 = inlined_call_operand.vmem [shape: bf16[4,8,128], index: 8, kind: input, shape index: {}]   ;;  %s3919_s9 = inlined_call_operand.vmem [shape: f32[1,128], index: 9, kind: input, shape index: {}]   ;;  %s3920_s10 = inlined_call_operand.vmem [shape: bf16[128,128], index: 10, kind: input, shape index: {}]   ;;  %s3921_s11 = inlined_call_operand.vmem [shape: f32[1,128], index: 11, kind: input, shape index: {}]   ;;  %s3922_s12 = inlined_call_operand.vmem [shape: bf16[128,128], index: 12, kind: input, shape index: {}]   ;;  %s3923_s13 = inlined_call_operand.vmem [shape: f32[1,128], index: 13, kind: input, shape index: {}]   ;;  %s3924_s14 = inlined_call_operand.vmem [shape: f32[1,128], index: 14, kind: input, shape index: {}]   ;;  %s3925_s15 = inlined_call_operand.vmem [shape: f32[1,128], index: 15, kind: input, shape index: {}]   ;;  %s3926_s16 = inlined_call_operand.vmem [shape: f32[1,128], index: 16, kind: input, shape index: {}]   ;;  %s3927_s17 = inlined_call_operand.vmem [shape: f32[1,128], index: 17, kind: input, shape index: {}]   ;;  %s3928_s18 = inlined_call_operand.hbm [shape: f32[2,8,128], index: 18, kind: output, shape index: {0}]   ;;  %s3929_s19 = inlined_call_operand.hbm [shape: f32[2,8,8], index: 19, kind: output, shape index: {1}]  }
   0x1   :  { %3941 = sst [smem:[#allocation17_spill]] %s3910_s0 }
   0x2   :  { %3942 = sst [smem:[#allocation18_spill]] %s3911_s1 }
   0x3   :  { %3943 = sst [smem:[#allocation19_spill]] %s3912_s2 }
   0x4   :  { %3944 = sst [smem:[#allocation20_spill]] %s3913_s3 }
   0x5   :  { %3945 = sst [smem:[#allocation21_spill]] %s3914_s4 }
   0x6   :  { %3946 = sst [smem:[#allocation22_spill]] %s3915_s5 }
   0x7   :  { %3947 = sst [smem:[#allocation23_spill]] %s3916_s6 }
   0x8   :  { %3948 = sst [smem:[#allocation24_spill]] %s3917_s7 }
   0x9   :  { %3949 = sst [smem:[#allocation25_spill]] %s3927_s17 }
   0xa   :  { %3950 = sst [smem:[#allocation26_spill]] %s3928_s18 }
   0xb   :  { %25 = vsyncpa [#allocation5], 0 }
   0xc   :  { %27 = vsyncpa [#allocation5 + $0x1], 0 }
   0xd   :  { %28 = vsyncpa [#allocation7], 0 }
   0xe   :  { %30 = vsyncpa [#allocation7 + $0x1], 0  ;;  %s3299_s0 = smov 0   ;;  %s3301_s30 = smov 0  }
   0xf   :  { %s3303_s20 = smov 0   ;;  %s3305_s21 = smov 0  }
  0x10   :  { %s3307_s1 = smov 0   ;;  %s3309_s22 = smov 0  }
  0x11 LB: > { %3951 = sst [smem:[#allocation10_spill]] %s3176_s0  ;;  %s2400_s2 = sadd.s32 4294967295, %s3196_s22   ;;  %s3196_s22 = sphi %s3309_s22, %s36_s22   ;;  %s3192_s1 = sphi %s3307_s1, %s3979_s1   ;;  %s3188_s21 = sphi %s3305_s21, %s3978_s21   ;;  %s3184_s20 = sphi %s3303_s20, %s3977_s20   ;;  %s3180_s30 = sphi %s3301_s30, %s3981_s30   ;;  %s3176_s0 = sphi %s3299_s0, %s3980_s0  }
  0x12   : > { %3952 = sst [smem:[#allocation11_spill]] %s3184_s20  ;;  %s2401_s23 = sadd.s32 4294967294, %s3196_s22  }
  0x13   : > { %3953 = sst [smem:[#allocation12_spill]] %s3192_s1  ;;  %s48_s24 = sadd.s32 1, %s3192_s1 }
  0x14   : > { %3954 = sst [smem:[#allocation13_spill]] %s3196_s22  ;;  %s445_s25 = sadd.s32 1, %s3184_s20 }
  0x15   : > { %p50_p0 = scmp.ge.s32.totalorder %s48_s24, 2  ;;  %p455_p1 = scmp.ne.s32.totalorder %s3184_s20, %s3180_s30 }
  0x16   : > { %p456_p2 = scmp.eq.s32.totalorder %s2400_s2, 1  ;;  %p461_p3 = scmp.ne.s32.totalorder %s3180_s30, %s3176_s0 }
  0x17   : > { %s3983_s24 = smov (%p50_p0, %s48_s24), 0  ;;  %p462_p5 = scmp.eq.s32.totalorder %s2401_s23, 1 }
  0x18   : > { %3955 = sst [smem:[#allocation14_spill]] %s3983_s24  ;;  %p3339_p4 = por %p456_p2, %p455_p1 }
  0x19   : > { %s440_s26 = ssub.s32 %s3192_s1, %s3983_s24  ;;  %p2404_p6 = scmp.ge.s32.totalorder %s3196_s22, 1 }
  0x1a   : > { %p443_p7 = scmp.eq.s32.totalorder %s440_s26, 0  ;;  %p3346_p8 = por %p462_p5, %p461_p3 }
  0x1b   : > { %p569_p9 = scmp.lt.s32.totalorder %s3196_s22, 3 }
  0x1c   : > { %s3957_s27 = scalar_select %p3346_p8, 1, 0 }
  0x1d   : > { %s3352_s28 = scalar_select %p443_p7, %s3184_s20, %s445_s25  }
  0x1e   : > { %3958 = sst [smem:[#allocation15_spill]] %s3957_s27  ;;  %p570_p10 = pnand %p2404_p6, %p569_p9 }
  0x1f   : > { %3959 = sst [smem:[#allocation16_spill]] %s3352_s28  ;;  %p632_p11 = scmp.lt.s32.totalorder (!%p570_p10), %s3188_s21, 1 }
  0x20   : > { %573 = sbr.rel (%p570_p10) target bundleno = 1763 (0x6e3), region = 92  ;;  %s3960_s4 = sld [smem:[#allocation21_spill]] (!%p570_p10) }
  0x21   : > { %s3961_s26 = sld [smem:[#allocation17_spill]] (!%p570_p10) }
  0x22   : > { %s3962_s6 = sld [smem:[#allocation23_spill]] (!%p570_p10) }
  0x23   : > { %s3963_s23 = sld [smem:[#allocation19_spill]] (!%p570_p10) }
  0x24   : > { %s3964_s5 = sld [smem:[#allocation22_spill]] (!%p570_p10) }
  0x25   : > { %s3422_s24 = scalar_select %p632_p11, %s3188_s21, 1  ;;  %vm1298_vm0 = vcmask 60416   ;;  %vm1653_vm1 = vcmask 64512   ;;  %vm1850_vm2 = vcmask 1043456  }
  0x26   : > { %v2881_v0 = vld [vmem:[%s3960_s4 + $0x38] sm:$0xff]  ;;  %v2880_v3 = vld [vmem:[%s3960_s4 + $0x30] sm:$0xff]  ;;  %v2879_v8 = vld [vmem:[%s3960_s4 + $0x28] sm:$0xff]  ;;  %s3965_s7 = sld [smem:[#allocation24_spill]] }
  0x27   : > { %v2889_v1 = vld [vmem:[%s3960_s4 + $0x78] sm:$0xff]  ;;  %774 = vmatpush.bf16.msra.mxu0 %v2881_v0  ;;  %v2888_v4 = vld [vmem:[%s3960_s4 + $0x70] sm:$0xff]  ;;  %v2887_v9 = vld [vmem:[%s3960_s4 + $0x68] sm:$0xff]  ;;  %s2407_s0 = sshll.u32 %s3422_s24, 3 }
  0x28   : > { %v2897_v2 = vld [vmem:[%s3960_s4 + $0xb8] sm:$0xff]  ;;  %835 = vmatpush.bf16.msra.mxu1 %v2889_v1  ;;  %v2896_v5 = vld [vmem:[%s3960_s4 + $0xb0] sm:$0xff]  ;;  %v2895_v10 = vld [vmem:[%s3960_s4 + $0xa8] sm:$0xff]  ;;  %s635_s27 = scalar_lea.vmem %s3961_s26, %s2407_s0  ;;  %s3966_s0 = sld [smem:[#allocation20_spill]] }
  0x29   : > { %896 = vmatpush.bf16.msra.mxu2 %v2897_v2  ;;  %v2905_v6 = vld [vmem:[%s3960_s4 + $0xf8] sm:$0xff]  ;;  %v2904_v7 = vld [vmem:[%s3960_s4 + $0xf0] sm:$0xff]  ;;  %v2903_v11 = vld [vmem:[%s3960_s4 + $0xe8] sm:$0xff]  ;;  %s2870_s26 = sshll.u32 %s3188_s21, 3 }
  0x2a   : > { %957 = vmatpush.bf16.msra.mxu3 %v2905_v6  ;;  %v2878_v12 = vld [vmem:[%s3960_s4 + $0x20] sm:$0xff]  ;;  %v2877_v16 = vld [vmem:[%s3960_s4 + $0x18] sm:$0xff]  ;;  %v2876_v19 = vld [vmem:[%s3960_s4 + $0x10] sm:$0xff]  ;;  %s2282_s29 = scalar_lea.hbm %s3929_s19, %s2870_s26 }
  0x2b   : > { %775 = vmatpush.bf16.msra.mxu0 %v2880_v3  ;;  %v2886_v13 = vld [vmem:[%s3960_s4 + $0x60] sm:$0xff]  ;;  %v2885_v17 = vld [vmem:[%s3960_s4 + $0x58] sm:$0xff]  ;;  %v2884_v20 = vld [vmem:[%s3960_s4 + $0x50] sm:$0xff]  ;;  %s2286_s17 = sshll.u32 %s2282_s29, 4  ;;  %s2287_s17 = int_to_ptr.hbm [resolvable:$true] %s2286_s17 }
  0x2c   : > { %836 = vmatpush.bf16.msra.mxu1 %v2888_v4  ;;  %v2894_v14 = vld [vmem:[%s3960_s4 + $0xa0] sm:$0xff]  ;;  %v2893_v18 = vld [vmem:[%s3960_s4 + $0x98] sm:$0xff]  ;;  %v2892_v22 = vld [vmem:[%s3960_s4 + $0x90] sm:$0xff] }
  0x2d   : > { %897 = vmatpush.bf16.msra.mxu2 %v2896_v5  ;;  %v2902_v15 = vld [vmem:[%s3960_s4 + $0xe0] sm:$0xff]  ;;  %v2901_v21 = vld [vmem:[%s3960_s4 + $0xd8] sm:$0xff]  ;;  %v2875_v23 = vld [vmem:[%s3960_s4 + $0x8] sm:$0xff] }
  0x2e   : > { %958 = vmatpush.bf16.msra.mxu3 %v2904_v7  ;;  %v2883_v24 = vld [vmem:[%s3960_s4 + $0x48] sm:$0xff]  ;;  %v2900_v25 = vld [vmem:[%s3960_s4 + $0xd0] sm:$0xff]  ;;  %v2874_v27 = vld [vmem:[%s3960_s4] sm:$0xff]  ;;  %s3967_s28 = smov %s3966_s0 }
  0x2f   : > { %776 = vmatpush.bf16.msra.mxu0 %v2879_v8  ;;  %v2891_v26 = vld [vmem:[%s3960_s4 + $0x88] sm:$0xff]  ;;  %v2882_v29 = vld [vmem:[%s3960_s4 + $0x40] sm:$0xff]  ;;  %v2913_v30 = vld [vmem:[%s3962_s6 + $0x38] sm:$0xff] }
  0x30   : > { %837 = vmatpush.bf16.msra.mxu1 %v2887_v9  ;;  %v2899_v28 = vld [vmem:[%s3960_s4 + $0xc8] sm:$0xff]  ;;  %v2921_v31 = vld [vmem:[%s3962_s6 + $0x78] sm:$0xff]  ;;  %v3458_v32 = vld [vmem:[%s635_s27] sm:$0xff]  ;;  %s3968_s27 = sld [smem:[#allocation18_spill]] }
  0x31   : > { %898 = vmatpush.bf16.msra.mxu2 %v2895_v10  ;;  %v2890_v33 = vld [vmem:[%s3960_s4 + $0x80] sm:$0xff]  ;;  %v2929_v34 = vld [vmem:[%s3962_s6 + $0xb8] sm:$0xff]  ;;  %v3474_v37 = vpack.c.bf16 %v3458_v32, %v3458_v32  ;;  %v2912_v38 = vld [vmem:[%s3962_s6 + $0x30] sm:$0xff] }
  0x32   : > { %959 = vmatpush.bf16.msra.mxu3 %v2903_v11  ;;  %v2898_v35 = vld [vmem:[%s3960_s4 + $0xc0] sm:$0xff]  ;;  %v2937_v36 = vld [vmem:[%s3962_s6 + $0xf8] sm:$0xff]  ;;  %v2920_v39 = vld [vmem:[%s3962_s6 + $0x70] sm:$0xff] }
  0x33   : > { %777 = vmatpush.bf16.msra.mxu0 %v2878_v12  ;;  %v2928_v40 = vld [vmem:[%s3962_s6 + $0xb0] sm:$0xff]  ;;  %v2911_v42 = vld [vmem:[%s3962_s6 + $0x28] sm:$0xff]  ;;  %v2910_v46 = vld [vmem:[%s3962_s6 + $0x20] sm:$0xff] }
  0x34   : > { %838 = vmatpush.bf16.msra.mxu1 %v2886_v13  ;;  %v2936_v41 = vld [vmem:[%s3962_s6 + $0xf0] sm:$0xff]  ;;  %v2919_v43 = vld [vmem:[%s3962_s6 + $0x68] sm:$0xff]  ;;  %v2918_v47 = vld [vmem:[%s3962_s6 + $0x60] sm:$0xff] }
  0x35   : > { %899 = vmatpush.bf16.msra.mxu2 %v2894_v14  ;;  %v2927_v44 = vld [vmem:[%s3962_s6 + $0xa8] sm:$0xff]  ;;  %v2926_v48 = vld [vmem:[%s3962_s6 + $0xa0] sm:$0xff]  ;;  %v2909_v50 = vld [vmem:[%s3962_s6 + $0x18] sm:$0xff] }
  0x36   : > { %960 = vmatpush.bf16.msra.mxu3 %v2902_v15  ;;  %v2935_v45 = vld [vmem:[%s3962_s6 + $0xe8] sm:$0xff]  ;;  %v2934_v49 = vld [vmem:[%s3962_s6 + $0xe0] sm:$0xff]  ;;  %v2917_v51 = vld [vmem:[%s3962_s6 + $0x58] sm:$0xff]  ;;  %s638_s20 = scalar_lea.vmem %s3968_s27, %s3422_s24  ;;  %s3748_s24 = sand.u32 1, %s3180_s30  }
  0x37   : > { %778 = vmatpush.bf16.msra.mxu0 %v2877_v16  ;;  %v2925_v52 = vld [vmem:[%s3962_s6 + $0x98] sm:$0xff]  ;;  %v2908_v54 = vld [vmem:[%s3962_s6 + $0x10] sm:$0xff]  ;;  %v2907_v58 = vld [vmem:[%s3962_s6 + $0x8] sm:$0xff]  ;;  %s3100_s27 = sshra.s32 %s2287_s17, 4  ;;  %s3101_s27 = int_to_ptr.hbm [resolvable:$true] %s3100_s27 }
  0x38   : > { %839 = vmatpush.bf16.msra.mxu1 %v2885_v17  ;;  %v2933_v53 = vld [vmem:[%s3962_s6 + $0xd8] sm:$0xff]  ;;  %v2916_v55 = vld [vmem:[%s3962_s6 + $0x50] sm:$0xff]  ;;  %v2915_v59 = vld [vmem:[%s3962_s6 + $0x48] sm:$0xff]  ;;  %p3107_p1 = scmp.lt.s32.totalorder %s3101_s27, %s3929_s19 }
  0x39   : > { %900 = vmatpush.bf16.msra.mxu2 %v2893_v18  ;;  %v2924_v56 = vld [vmem:[%s3962_s6 + $0x90] sm:$0xff]  ;;  %v2923_v60 = vld [vmem:[%s3962_s6 + $0x88] sm:$0xff]  ;;  %v2906_v62 = vld [vmem:[%s3962_s6] sm:$0xff] }
  0x3a   : > { %961 = vmatpush.bf16.msra.mxu3 %v2901_v21  ;;  %v2932_v57 = vld [vmem:[%s3962_s6 + $0xd0] sm:$0xff]  ;;  %v2931_v61 = vld [vmem:[%s3962_s6 + $0xc8] sm:$0xff]  ;;  %v2914_v63 = vld [vmem:[%s3962_s6 + $0x40] sm:$0xff] }
  0x3b   : > { %779 = vmatpush.bf16.msra.mxu0 %v2876_v19  ;;  %v2945_v0 = vld [vmem:[%s3963_s23 + $0x38] sm:$0xff]  ;;  %v2922_v2 = vld [vmem:[%s3962_s6 + $0x80] sm:$0xff]  ;;  %v2944_v5 = vld [vmem:[%s3963_s23 + $0x30] sm:$0xff] }
  0x3c   : > { %840 = vmatpush.bf16.msra.mxu1 %v2884_v20  ;;  %v2953_v1 = vld [vmem:[%s3963_s23 + $0x78] sm:$0xff]  ;;  %v2930_v4 = vld [vmem:[%s3962_s6 + $0xc0] sm:$0xff]  ;;  %v2952_v6 = vld [vmem:[%s3963_s23 + $0x70] sm:$0xff] }
  0x3d   : > { %901 = vmatpush.bf16.msra.mxu2 %v2892_v22  ;;  %v2961_v3 = vld [vmem:[%s3963_s23 + $0xb8] sm:$0xff]  ;;  %v2960_v8 = vld [vmem:[%s3963_s23 + $0xb0] sm:$0xff]  ;;  %v2943_v9 = vld [vmem:[%s3963_s23 + $0x28] sm:$0xff] }
  0x3e   : > { %962 = vmatpush.bf16.msra.mxu3 %v2900_v25  ;;  %v2969_v7 = vld [vmem:[%s3963_s23 + $0xf8] sm:$0xff]  ;;  %v2951_v10 = vld [vmem:[%s3963_s23 + $0x68] sm:$0xff]  ;;  %v2968_v11 = vld [vmem:[%s3963_s23 + $0xf0] sm:$0xff] }
  0x3f   : > { %780 = vmatpush.bf16.msra.mxu0 %v2875_v23  ;;  %v2959_v12 = vld [vmem:[%s3963_s23 + $0xa8] sm:$0xff]  ;;  %v2942_v13 = vld [vmem:[%s3963_s23 + $0x20] sm:$0xff]  ;;  %v2941_v17 = vld [vmem:[%s3963_s23 + $0x18] sm:$0xff] }
  0x40   : > { %841 = vmatpush.bf16.msra.mxu1 %v2883_v24  ;;  %v2950_v14 = vld [vmem:[%s3963_s23 + $0x60] sm:$0xff]  ;;  %v2967_v15 = vld [vmem:[%s3963_s23 + $0xe8] sm:$0xff]  ;;  %v2949_v18 = vld [vmem:[%s3963_s23 + $0x58] sm:$0xff] }
  0x41   : > { %902 = vmatpush.bf16.msra.mxu2 %v2891_v26  ;;  %v2958_v16 = vld [vmem:[%s3963_s23 + $0xa0] sm:$0xff]  ;;  %v2957_v20 = vld [vmem:[%s3963_s23 + $0x98] sm:$0xff]  ;;  %v2940_v21 = vld [vmem:[%s3963_s23 + $0x10] sm:$0xff] }
  0x42   : > { %963 = vmatpush.bf16.msra.mxu3 %v2899_v28  ;;  %v2966_v19 = vld [vmem:[%s3963_s23 + $0xe0] sm:$0xff]  ;;  %v2948_v22 = vld [vmem:[%s3963_s23 + $0x50] sm:$0xff]  ;;  %v2965_v23 = vld [vmem:[%s3963_s23 + $0xd8] sm:$0xff] }
  0x43   : > { %781 = vmatpush.bf16.msra.mxu0 %v2874_v27  ;;  %v2956_v24 = vld [vmem:[%s3963_s23 + $0x90] sm:$0xff]  ;;  %v2939_v25 = vld [vmem:[%s3963_s23 + $0x8] sm:$0xff] }
  0x44   : > { %842 = vmatpush.bf16.msra.mxu1 %v2882_v29  ;;  %v2947_v26 = vld [vmem:[%s3963_s23 + $0x48] sm:$0xff]  ;;  %v2964_v27 = vld [vmem:[%s3963_s23 + $0xd0] sm:$0xff]  ;;  %v2938_v29 = vld [vmem:[%s3963_s23] sm:$0xff] }
  0x45   : > { %903 = vmatpush.bf16.msra.mxu2 %v2890_v33  ;;  %v2955_v28 = vld [vmem:[%s3963_s23 + $0x88] sm:$0xff]  ;;  %v2954_v33 = vld [vmem:[%s3963_s23 + $0x80] sm:$0xff] }
  0x46   : > { %964 = vmatpush.bf16.msra.mxu3 %v2898_v35  ;;  %782 = vmatmul.bf16.vlgmr.msra.gmra.mxu0 %v3474_v37  ;;  %v3047_v35 = vld [vmem:[%s3964_s5] ss:$0 sm:$0xff] }
  0x47   : > { %1098 = vmatpush.bf16.msrb.mxu0 %v2913_v30  ;;  %843 = vmatmul.bf16.vlgmr.msra.gmra.mxu1 %v3474_v37  ;;  %v2946_v30 = vld [vmem:[%s3963_s23 + $0x40] sm:$0xff] }
  0x48   : > { %1159 = vmatpush.bf16.msrb.mxu1 %v2921_v31  ;;  %904 = vmatmul.bf16.vlgmr.msra.gmra.mxu2 %v3474_v37  ;;  %v2963_v31 = vld [vmem:[%s3963_s23 + $0xc8] sm:$0xff] }
  0x49   : > { %1220 = vmatpush.bf16.msrb.mxu2 %v2929_v34  ;;  %965 = vmatmul.bf16.vlgmr.msra.gmra.mxu3 %v3474_v37  ;;  %v2962_v34 = vld [vmem:[%s3963_s23 + $0xc0] sm:$0xff] }
  0x4a   : > { %1281 = vmatpush.bf16.msrb.mxu3 %v2937_v36  ;;  %v3048_v36 = vld [vmem:[%s3964_s5 + $0x1] ss:$0 sm:$0xff] }
  0x4b   : > { %1099 = vmatpush.bf16.msrb.mxu0 %v2912_v38 }
  0x4c   : > { %1160 = vmatpush.bf16.msrb.mxu1 %v2920_v39 }
  0x4d   : > { %1221 = vmatpush.bf16.msrb.mxu2 %v2928_v40 }
  0x4e   : > { %1282 = vmatpush.bf16.msrb.mxu3 %v2936_v41 }
  0x4f   : > { %1100 = vmatpush.bf16.msrb.mxu0 %v2911_v42 }
  0x50   : > { %1161 = vmatpush.bf16.msrb.mxu1 %v2919_v43 }
  0x51   : > { %1222 = vmatpush.bf16.msrb.mxu2 %v2927_v44  ;;  %v3051_v44 = vld [vmem:[%s3964_s5 + $0x3] ss:$0 sm:$0xff] }
  0x52   : > { %1283 = vmatpush.bf16.msrb.mxu3 %v2935_v45 }
  0x53   : > { %1101 = vmatpush.bf16.msrb.mxu0 %v2910_v46 }
  0x54   : > { %1162 = vmatpush.bf16.msrb.mxu1 %v2918_v47 }
  0x55   : > { %1223 = vmatpush.bf16.msrb.mxu2 %v2926_v48 }
  0x56   : > { %1284 = vmatpush.bf16.msrb.mxu3 %v2934_v49 }
  0x57   : > { %1102 = vmatpush.bf16.msrb.mxu0 %v2909_v50 }
  0x58   : > { %1163 = vmatpush.bf16.msrb.mxu1 %v2917_v51 }
  0x59   : > { %1224 = vmatpush.bf16.msrb.mxu2 %v2925_v52 }
  0x5a   : > { %1285 = vmatpush.bf16.msrb.mxu3 %v2933_v53 }
  0x5b   : > { %1103 = vmatpush.bf16.msrb.mxu0 %v2908_v54 }
  0x5c   : > { %1164 = vmatpush.bf16.msrb.mxu1 %v2916_v55 }
  0x5d   : > { %1225 = vmatpush.bf16.msrb.mxu2 %v2924_v56 }
  0x5e   : > { %1286 = vmatpush.bf16.msrb.mxu3 %v2932_v57 }
  0x5f   : > { %1104 = vmatpush.bf16.msrb.mxu0 %v2907_v58 }
  0x60   : > { %1165 = vmatpush.bf16.msrb.mxu1 %v2915_v59 }
  0x61   : > { %1226 = vmatpush.bf16.msrb.mxu2 %v2923_v60 }
  0x62   : > { %1287 = vmatpush.bf16.msrb.mxu3 %v2931_v61  ;;  %v3050_v61 = vld [vmem:[%s3965_s7] ss:$0 sm:$0xff] }
  0x63   : > { %1105 = vmatpush.bf16.msrb.mxu0 %v2906_v62  ;;  %v3052_v62 = vld [vmem:[%s3965_s7 + $0x1] ss:$0 sm:$0xff] }
  0x64   : > { %1166 = vmatpush.bf16.msrb.mxu1 %v2914_v63 }
  0x65   : > { %1227 = vmatpush.bf16.msrb.mxu2 %v2922_v2 }
  0x66   : > { %1106 = vmatmul.bf16.vlgmr.msrb.gmra.mxu0 %v3474_v37  ;;  %1288 = vmatpush.bf16.msrb.mxu3 %v2930_v4 }
  0x67   : > { %1443 = vmatpush.bf16.msra.mxu0 %v2945_v0  ;;  %1167 = vmatmul.bf16.vlgmr.msrb.gmra.mxu1 %v3474_v37 }
  0x68   : > { %1504 = vmatpush.bf16.msra.mxu1 %v2953_v1  ;;  %1228 = vmatmul.bf16.vlgmr.msrb.gmra.mxu2 %v3474_v37 }
  0x69   : > { %1565 = vmatpush.bf16.msra.mxu2 %v2961_v3  ;;  %1289 = vmatmul.bf16.vlgmr.msrb.gmra.mxu3 %v3474_v37 }
  0x6a   : > { %1626 = vmatpush.bf16.msra.mxu3 %v2969_v7  ;;  %v3053_v7 = vld [vmem:[%s3965_s7 + $0x2] ss:$0 sm:$0xff] }
  0x6b   : > { %1444 = vmatpush.bf16.msra.mxu0 %v2944_v5 }
  0x6c   : > { %1505 = vmatpush.bf16.msra.mxu1 %v2952_v6 }
  0x6d   : > { %1566 = vmatpush.bf16.msra.mxu2 %v2960_v8  ;;  %v3054_v8 = vld [vmem:[%s3965_s7 + $0x3] ss:$0 sm:$0xff] }
  0x6e   : > { %1627 = vmatpush.bf16.msra.mxu3 %v2968_v11 }
  0x6f   : > { %1445 = vmatpush.bf16.msra.mxu0 %v2943_v9 }
  0x70   : > { %1506 = vmatpush.bf16.msra.mxu1 %v2951_v10 }
  0x71   : > { %1567 = vmatpush.bf16.msra.mxu2 %v2959_v12 }
  0x72   : > { %1628 = vmatpush.bf16.msra.mxu3 %v2967_v15 }
  0x73   : > { %1446 = vmatpush.bf16.msra.mxu0 %v2942_v13 }
  0x74   : > { %1507 = vmatpush.bf16.msra.mxu1 %v2950_v14 }
  0x75   : > { %1568 = vmatpush.bf16.msra.mxu2 %v2958_v16 }
  0x76   : > { %1629 = vmatpush.bf16.msra.mxu3 %v2966_v19 }
  0x77   : > { %1447 = vmatpush.bf16.msra.mxu0 %v2941_v17 }
  0x78   : > { %1508 = vmatpush.bf16.msra.mxu1 %v2949_v18 }
  0x79   : > { %1569 = vmatpush.bf16.msra.mxu2 %v2957_v20 }
  0x7a   : > { %1630 = vmatpush.bf16.msra.mxu3 %v2965_v23  ;;  %v3055_v23 = vld [vmem:[%s3966_s0] ss:$0 sm:$0xff]  ;;  %s3940_s0 = sshll.u32 %s3748_s24, 3 }
  0x7b   : > { %1448 = vmatpush.bf16.msra.mxu0 %v2940_v21  ;;  %s3758_s1 = scalar_lea.vmem [#allocation6], %s3940_s0  ;;  %s2256_s0 = scalar_lea.sflag [#allocation7], %s3748_s24 }
  0x7c   : > { %1509 = vmatpush.bf16.msra.mxu1 %v2948_v22  ;;  %s2284_s2 = sshll.u32 %s3758_s1, 4  ;;  %s2285_s2 = int_to_ptr.vmem [resolvable:$true] %s2284_s2 }
  0x7d   : > { %1570 = vmatpush.bf16.msra.mxu2 %v2956_v24  ;;  %v3056_v24 = vld [vmem:[%s3967_s28 + $0x1] ss:$0 sm:$0xff] }
  0x7e   : > { %1631 = vmatpush.bf16.msra.mxu3 %v2964_v27 }
  0x7f   : > { %1449 = vmatpush.bf16.msra.mxu0 %v2939_v25 }
  0x80   : > { %1510 = vmatpush.bf16.msra.mxu1 %v2947_v26 }
  0x81   : > { %1571 = vmatpush.bf16.msra.mxu2 %v2955_v28 }
  0x82   : > { %1632 = vmatpush.bf16.msra.mxu3 %v2963_v31 }
  0x83   : > { %1450 = vmatpush.bf16.msra.mxu0 %v2938_v29 }
  0x84   : > { %1511 = vmatpush.bf16.msra.mxu1 %v2946_v30 }
  0x85   : > { %1572 = vmatpush.bf16.msra.mxu2 %v2954_v33 }
  0x86   : > { %1451 = vmatmul.bf16.vlgmr.msra.gmra.mxu0 %v3474_v37  ;;  %1633 = vmatpush.bf16.msra.mxu3 %v2962_v34 }
  0x87   : > { %1512 = vmatmul.bf16.vlgmr.msra.gmra.mxu1 %v3474_v37 }
  0x88   : > { %1573 = vmatmul.bf16.vlgmr.msra.gmra.mxu2 %v3474_v37 }
  0x89   : > { %1634 = vmatmul.bf16.vlgmr.msra.gmra.mxu3 %v3474_v37  ;;  %v3049_v37 = vld [vmem:[%s3964_s5 + $0x2] ss:$0 sm:$0xff]  ;;  %s3106_s5 = scalar_lea.hbm %s3929_s19, 16 }
  0xc3   : > { %v783_v38 = vpop.f32.mrf.mxu0 }
  0xc4   : > { %v784_v39 = vadd.f32 %v3047_v35, %v783_v38  ;;  %v844_v40 = vpop.f32.mrf.mxu1 }
  0xc5   : > { %v845_v42 = vadd.f32 %v3048_v36, %v844_v40 }
  0xc6   : > { %v1294_v41 = vpack.c.bf16 %v784_v39, %v784_v39  ;;  %v3057_v39 = vld [vmem:[%s3967_s28 + $0x2] ss:$0 sm:$0xff] }
  0xc7   : > { %v1295_v43 = vpack.c.bf16 %v845_v42, %v845_v42 }
  0xc8   : > { %1299 = vst.msk [vmem:[#allocation2] sm:$0xf] %vm1298_vm0, %v1294_v41  ;;  %v3058_v41 = vld [vmem:[%s3967_s28 + $0x3] ss:$0 sm:$0xff] }
  0xc9   : > { %1300 = vst.msk [vmem:[#allocation2 + $0x4] sm:$0xf] %vm1298_vm0, %v1295_v43 }
  0xcb   : > { %v785_v45 = vpop.f32.mrf.mxu0  ;;  %v905_v46 = vpop.f32.mrf.mxu2 }
  0xcc   : > { %v906_v47 = vadd.f32 %v3049_v37, %v905_v46  ;;  %v966_v48 = vpop.f32.mrf.mxu3  ;;  %v846_v49 = vpop.f32.mrf.mxu1 }
  0xcd   : > { %v967_v50 = vadd.f32 %v3051_v44, %v966_v48  ;;  %v1643_v48 = vld [vmem:[%s638_s20] sm:$0x1]  ;;  %v3198_v49 = vmov 0.0   ;;  %s3102_s20 = scalar_lea.hbm %s3101_s27, 8 }
  0xce   : > { %v1296_v51 = vpack.c.bf16 %v906_v47, %v906_v47  ;;  %vm1644_vm3 = vcmp.gt.f32.partialorder %v1643_v48, 0.5  ;;  %p3103_p12 = scmp.ne.s32.totalorder %s3101_s27, %s3102_s20  ;;  %p3108_p2 = scmp.lt.s32.totalorder %s3106_s5, %s3102_s20 }
  0xcf   : > { %v1646_v52 = vld [vmem:[#allocation2] sm:$0xf]  ;;  %v1297_v53 = vpack.c.bf16 %v967_v50, %v967_v50  ;;  %v1645_v50 = vsel %vm1644_vm3, -inf, %v3198_v49 }
  0xd0   : > { %1301 = vst.msk [vmem:[#allocation2 + $0x8] sm:$0xf] %vm1298_vm0, %v1296_v51  ;;  %v1658_v54 = vsel %vm1653_vm1, %v1646_v52, 0  ;;  %v1647_v55 = vld [vmem:[#allocation2 + $0x4] sm:$0xf]  ;;  %v1651_v51 = vperm.slane %v1645_v50, 0  ;;  %p3104_p13 = pnand %p3103_p12, %p3339_p4  ;;  %p3109_p3 = por %p3108_p2, %p3107_p1 }
  0xd1   : > { %1667 = vmatpush.bf16.xpose.msrb.mxu2 %v1658_v54  ;;  %1302 = vst.msk [vmem:[#allocation2 + $0xc] sm:$0xf] %vm1298_vm0, %v1297_v53  ;;  %v1677_v56 = vsel %vm1653_vm1, %v1647_v55, 0 }
  0xd2   : > { %1686 = vmatpush.bf16.xpose.msrb.mxu3 %v1677_v56  ;;  %p3105_p0 = pneg %p3104_p13 }
  0xd3   : > { %v907_v57 = vpop.f32.mrf.mxu2 }
  0xd4   : > { %v968_v58 = vpop.f32.mrf.mxu3  ;;  %p3110_p5 = pnand %p3109_p3, %p3105_p0 }
  0xd7   : > { %v1648_v59 = vld [vmem:[#allocation2 + $0x8] sm:$0xf] }
  0xd8   : > { %v1696_v60 = vsel %vm1653_vm1, %v1648_v59, 0  ;;  %v1649_v2 = vld [vmem:[#allocation2 + $0xc] sm:$0xf] }
  0xd9   : > { %1705 = vmatpush.bf16.xpose.msra.mxu2 %v1696_v60  ;;  %v1715_v4 = vsel %vm1653_vm1, %v1649_v2, 0 }
  0xda   : > { %1724 = vmatpush.bf16.xpose.msra.mxu3 %v1715_v4 }
  0xe3   : > { %v1107_v63 = vpop.f32.mrf.mxu0 }
  0xe4   : > { %v1108_v0 = vadd.f32 %v3050_v61, %v1107_v63  ;;  %v1168_v1 = vpop.f32.mrf.mxu1 }
  0xe5   : > { %v1169_v3 = vadd.f32 %v3052_v62, %v1168_v1 }
  0xe6   : > { %v1303_v5 = vpack.c.bf16 %v1108_v0, %v1108_v0 }
  0xe7   : > { %v1304_v6 = vpack.c.bf16 %v1169_v3, %v1169_v3 }
  0xe8   : > { %1307 = vst.msk [vmem:[#allocation3] sm:$0xf] %vm1298_vm0, %v1303_v5 }
  0xe9   : > { %1308 = vst.msk [vmem:[#allocation3 + $0x4] sm:$0xf] %vm1298_vm0, %v1304_v6 }
  0xeb   : > { %v1109_v9 = vpop.f32.mrf.mxu0  ;;  %v1229_v11 = vpop.f32.mrf.mxu2 }
  0xec   : > { %v1170_v10 = vpop.f32.mrf.mxu1  ;;  %v1230_v12 = vadd.f32 %v3053_v7, %v1229_v11  ;;  %v1290_v13 = vpop.f32.mrf.mxu3 }
  0xed   : > { %v1291_v14 = vadd.f32 %v3054_v8, %v1290_v13 }
  0xee   : > { %v1305_v15 = vpack.c.bf16 %v1230_v12, %v1230_v12 }
  0xef   : > { %v1843_v16 = vld [vmem:[#allocation3] sm:$0xf]  ;;  %v1306_v18 = vpack.c.bf16 %v1291_v14, %v1291_v14 }
  0xf0   : > { %v1852_v17 = vsel %vm1850_vm2, %v1843_v16, 0  ;;  %v1844_v19 = vld [vmem:[#allocation3 + $0x4] sm:$0xf]  ;;  %1309 = vst.msk [vmem:[#allocation3 + $0x8] sm:$0xf] %vm1298_vm0, %v1305_v15 }
  0xf1   : > { %1861 = vmatpush.bf16.msrb.mxu0 %v1852_v17  ;;  %v1871_v20 = vsel %vm1850_vm2, %v1844_v19, 0  ;;  %1310 = vst.msk [vmem:[#allocation3 + $0xc] sm:$0xf] %vm1298_vm0, %v1306_v18 }
  0xf2   : > { %1880 = vmatpush.bf16.msrb.mxu1 %v1871_v20 }
  0xf3   : > { %v1231_v21 = vpop.f32.mrf.mxu2 }
  0xf4   : > { %v1292_v22 = vpop.f32.mrf.mxu3 }
  0xf7   : > { %v1845_v27 = vld [vmem:[#allocation3 + $0x8] sm:$0xf] }
  0xf8   : > { %v1846_v28 = vld [vmem:[#allocation3 + $0xc] sm:$0xf]  ;;  %v1890_v34 = vsel %vm1850_vm2, %v1845_v27, 0 }
  0xf9   : > { %v1909_v35 = vsel %vm1850_vm2, %v1846_v28, 0 }
 0x103   : > { %v1452_v25 = vpop.f32.mrf.mxu0 }
 0x104   : > { %v1513_v26 = vpop.f32.mrf.mxu1  ;;  %v1453_v29 = vadd.f32 %v3055_v23, %v1452_v25 }
 0x105   : > { %v1514_v30 = vadd.f32 %v3056_v24, %v1513_v26 }
 0x106   : > { %v1639_v31 = vpack.c.bf16 %v1453_v29, %v1453_v29 }
 0x107   : > { %v1640_v33 = vpack.c.bf16 %v1514_v30, %v1514_v30 }
 0x108   : > { %2792 = vmatmul.msk.bf16.vlgmr.msrb.gmra.mxu2 %vm1653_vm1, %v1639_v31 }
 0x109   : > { %2793 = vmatmul.msk.bf16.vlgmr.msrb.gmra.mxu3 %vm1653_vm1, %v1640_v33  ;;  %1899 = vmatpush.bf16.msrb.mxu2 %v1890_v34 }
 0x10a   : > { %1918 = vmatpush.bf16.msrb.mxu3 %v1909_v35 }
 0x10b   : > { %v1454_v36 = vpop.f32.mrf.mxu0  ;;  %v1574_v40 = vpop.f32.mrf.mxu2 }
 0x10c   : > { %v1515_v38 = vpop.f32.mrf.mxu1  ;;  %v1635_v42 = vpop.f32.mrf.mxu3  ;;  %v1575_v43 = vadd.f32 %v3057_v39, %v1574_v40 }
 0x10d   : > { %v1636_v37 = vadd.f32 %v3058_v41, %v1635_v42 }
 0x10e   : > { %v1641_v44 = vpack.c.bf16 %v1575_v43, %v1575_v43 }
 0x10f   : > { %v1642_v46 = vpack.c.bf16 %v1636_v37, %v1636_v37 }
 0x113   : > { %v1576_v45 = vpop.f32.mrf.mxu2 }
 0x114   : > { %v1637_v47 = vpop.f32.mrf.mxu3 }
 0x118   : > { %2794 = vmatmul.msk.bf16.vlgmr.msra.gmra.mxu2 %vm1653_vm1, %v1641_v44 }
 0x119   : > { %2795 = vmatmul.msk.bf16.vlgmr.msra.gmra.mxu3 %vm1653_vm1, %v1642_v46 }
 0x18b   : > { %v1669_v52 = vpop.f32.mrf.mxu2 }
 0x18c   : > { %v1688_v53 = vpop.f32.mrf.mxu3  ;;  %v1670_v54 = vadd.f32 %v1669_v52, %v1651_v51 }
 0x18d   : > { %v1689_v56 = vadd.f32 %v1688_v53, %v1651_v51 }
 0x18e   : > { %v1730_v55 = vsel %vm1653_vm1, %v1670_v54, -inf }
 0x18f   : > { %1731 = vmax.xlane.f32.xlu1 %v1730_v55  ;;  %v1733_v59 = vsel %vm1653_vm1, %v1689_v56, -inf }
 0x193   : > { %v1671_v57 = vpop.f32.mrf.mxu2 }
 0x194   : > { %v1690_v58 = vpop.f32.mrf.mxu3 }
 0x197   : > { %1734 = vmax.xlane.f32.xlu1 %v1733_v59 }
 0x19b   : > { %v1707_v60 = vpop.f32.mrf.mxu2 }
 0x19c   : > { %v1726_v61 = vpop.f32.mrf.mxu3  ;;  %v1708_v62 = vadd.f32 %v1707_v60, %v1651_v51 }
 0x19d   : > { %v1727_v0 = vadd.f32 %v1726_v61, %v1651_v51 }
 0x19e   : > { %v1736_v63 = vsel %vm1653_vm1, %v1708_v62, -inf }
 0x19f   : > { %1737 = vmax.xlane.f32.xlu0 %v1736_v63  ;;  %v1739_v3 = vsel %vm1653_vm1, %v1727_v0, -inf }
 0x1a3   : > { %v1709_v1 = vpop.f32.mrf.mxu2 }
 0x1a4   : > { %v1728_v2 = vpop.f32.mrf.mxu3 }
 0x1a7   : > { %1740 = vmax.xlane.f32.xlu0 %v1739_v3 }
 0x202   : > { %v1732_v4 = vpop.xlane.xlu1 %1731 }
 0x203   : > { %v1742_v5 = vsub.f32 %v1670_v54, %v1732_v4 }
 0x205   : > { %v1746_v6 = vmul.f32 1.442695, %v1742_v5 }
 0x207   : > { %3066 = vpow2.f32 %v1746_v6 }
 0x20a   : > { %v1735_v7 = vpop.xlane.xlu1 %1734 }
 0x20b   : > { %v1743_v8 = vsub.f32 %v1689_v56, %v1735_v7 }
 0x20d   : > { %v3067_v9 = vpop.eup %3066  ;;  %v1748_v10 = vmul.f32 1.442695, %v1743_v8 }
 0x20e   : > { %v1754_v11 = vsel %vm1653_vm1, %v3067_v9, 0.0 }
 0x20f   : > { %3068 = vpow2.f32 %v1748_v10  ;;  %1755 = vadd.xlane.f32.xlu0 %v1754_v11 }
 0x212   : > { %v1738_v12 = vpop.xlane.xlu0 %1737 }
 0x213   : > { %v1744_v13 = vsub.f32 %v1708_v62, %v1738_v12 }
 0x215   : > { %v3069_v14 = vpop.eup %3068  ;;  %v1750_v15 = vmul.f32 1.442695, %v1744_v13 }
 0x216   : > { %v1757_v16 = vsel %vm1653_vm1, %v3069_v14, 0.0 }
 0x217   : > { %3070 = vpow2.f32 %v1750_v15  ;;  %1758 = vadd.xlane.f32.xlu1 %v1757_v16 }
 0x21a   : > { %v1741_v17 = vpop.xlane.xlu0 %1740 }
 0x21b   : > { %v1745_v18 = vsub.f32 %v1727_v0, %v1741_v17 }
 0x21d   : > { %v3734_v19 = vpop.eup %3070  ;;  %v1752_v20 = vmul.f32 1.442695, %v1745_v18 }
 0x21e   : > { %v1760_v21 = vsel %vm1653_vm1, %v3734_v19, 0.0 }
 0x21f   : > { %3072 = vpow2.f32 %v1752_v20  ;;  %1761 = vadd.xlane.f32.xlu2 %v1760_v21  ;;  %v1928_v21 = vld [vmem:[%s3918_s8] sm:$0xf] }
 0x225   : > { %v3738_v22 = vpop.eup %3072 }
 0x226   : > { %v1763_v23 = vsel %vm1653_vm1, %v3738_v22, 0.0 }
 0x227   : > { %1764 = vadd.xlane.f32.xlu2 %v1763_v23  ;;  %v1929_v23 = vld [vmem:[%s3918_s8 + $0x4] sm:$0xf] }
 0x282   : > { %v1756_v24 = vpop.xlane.xlu0 %1755 }
 0x283   : > { %3074 = vrcp.f32 %v1756_v24  ;;  %v1777_v29 = vand.u32 2147483648, %v1756_v24  ;;  %v1775_v31 = vand.u32 2147483647, %v1756_v24  ;;  %vm1771_vm5 = vweird.f32 %v1756_v24 }
 0x285   : > { %v1778_v35 = vor.u32 1.1754944e-38, %v1777_v29  ;;  %vm1776_vm7 = vcmp.eq.f32.partialorder %v1775_v31, 8.507059e+37 }
 0x289   : > { %v3075_v25 = vpop.eup %3074 }
 0x28a   : > { %v1767_v26 = vmul.f32 %v3075_v25, %v1756_v24  ;;  %v1759_v27 = vpop.xlane.xlu1 %1758  ;;  %vm1772_vm4 = vweird.f32 %v3075_v25  ;;  %v1955_v24 = vsel %vm1850_vm2, %v1929_v23, 0 }
 0x28b   : > { %3076 = vrcp.f32 %v1759_v27  ;;  %vm1773_vm6 = vmor %vm1771_vm5, %vm1772_vm4  ;;  %v1792_v43 = vand.u32 2147483648, %v1759_v27  ;;  %v1790_v44 = vand.u32 2147483647, %v1759_v27  ;;  %vm1786_vm9 = vweird.f32 %v1759_v27  ;;  %1964 = vmatpush.bf16.msra.mxu1 %v1955_v24  ;;  %v3061_v24 = vld [vmem:[%s3925_s15] ss:$0 sm:$0xff] }
 0x28c   : > { %v1768_v28 = vsub.f32 1.0, %v1767_v26 }
 0x28d   : > { %v1793_v48 = vor.u32 1.1754944e-38, %v1792_v43  ;;  %vm1791_vm11 = vcmp.eq.f32.partialorder %v1790_v44, 8.507059e+37 }
 0x28e   : > { %v1769_v30 = vmul.f32 %v3075_v25, %v1768_v28 }
 0x290   : > { %v1770_v33 = vadd.f32 %v3075_v25, %v1769_v30 }
 0x291   : > { %v3077_v34 = vpop.eup %3076 }
 0x292   : > { %v1774_v36 = vsel %vm1773_vm6, %v3075_v25, %v1770_v33  ;;  %v1782_v38 = vmul.f32 %v3077_v34, %v1759_v27  ;;  %v1762_v39 = vpop.xlane.xlu2 %1761  ;;  %vm1787_vm8 = vweird.f32 %v3077_v34  ;;  %v1930_v25 = vld [vmem:[%s3918_s8 + $0x8] sm:$0xf]  ;;  %v1931_v27 = vld [vmem:[%s3918_s8 + $0xc] sm:$0xf] }
 0x293   : > { %v1779_v40 = vsel %vm1776_vm7, %v1778_v35, %v1774_v36  ;;  %3078 = vrcp.f32 %v1762_v39  ;;  %vm1788_vm10 = vmor %vm1786_vm9, %vm1787_vm8  ;;  %v1807_v55 = vand.u32 2147483648, %v1762_v39  ;;  %v1805_v57 = vand.u32 2147483647, %v1762_v39 }
 0x294   : > { %v1826_v41 = vmul.f32 %v3067_v9, %v1779_v40  ;;  %v1783_v42 = vsub.f32 1.0, %v1782_v38  ;;  %vm1801_vm13 = vweird.f32 %v1762_v39  ;;  %v1974_v26 = vsel %vm1850_vm2, %v1930_v25, 0 }
 0x295   : > { %v1808_v61 = vor.u32 1.1754944e-38, %v1807_v55  ;;  %vm1806_vm15 = vcmp.eq.f32.partialorder %v1805_v57, 8.507059e+37  ;;  %1983 = vmatpush.bf16.msra.mxu2 %v1974_v26  ;;  %v1993_v28 = vsel %vm1850_vm2, %v1931_v27, 0 }
 0x296   : > { %v1784_v37 = vmul.f32 %v3077_v34, %v1783_v42  ;;  %v1839_v45 = vpack.c.bf16 %v1826_v41, %v1826_v41  ;;  %v1830_v11 = vsel %vm1653_vm1, %v1826_v41, 0.0  ;;  %2002 = vmatpush.bf16.msra.mxu3 %v1993_v28  ;;  %v2979_v28 = vld [vmem:[%s3922_s12 + $0x8] sm:$0xff] }
 0x298   : > { %v1785_v46 = vadd.f32 %v3077_v34, %v1784_v37  ;;  %2796 = vmatmul.msk.bf16.vlgmr.msrb.gmra.mxu0 %vm1653_vm1, %v1839_v45 }
 0x299   : > { %v3079_v47 = vpop.eup %3078 }
 0x29a   : > { %v1789_v49 = vsel %vm1788_vm10, %v3077_v34, %v1785_v46  ;;  %v1797_v50 = vmul.f32 %v3079_v47, %v1762_v39  ;;  %v1765_v51 = vpop.xlane.xlu2 %1764  ;;  %vm1802_vm12 = vweird.f32 %v3079_v47 }
 0x29b   : > { %v1794_v52 = vsel %vm1791_vm11, %v1793_v48, %v1789_v49  ;;  %3080 = vrcp.f32 %v1765_v51  ;;  %vm1803_vm14 = vmor %vm1801_vm13, %vm1802_vm12  ;;  %v1822_v3 = vand.u32 2147483648, %v1765_v51  ;;  %v1820_v5 = vand.u32 2147483647, %v1765_v51  ;;  %v3059_v49 = vld [vmem:[%s3919_s9] ss:$0 sm:$0xff] }
 0x29c   : > { %v1827_v53 = vmul.f32 %v3069_v14, %v1794_v52  ;;  %v1798_v54 = vsub.f32 1.0, %v1797_v50  ;;  %vm1816_vm3 = vweird.f32 %v1765_v51 }
 0x29d   : > { %v1823_v9 = vor.u32 1.1754944e-38, %v1822_v3  ;;  %vm1821_vm5 = vcmp.eq.f32.partialorder %v1820_v5, 8.507059e+37  ;;  %v2970_v3 = vld [vmem:[%s3920_s10] sm:$0xff] }
 0x29e   : > { %v1799_v56 = vmul.f32 %v3079_v47, %v1798_v54  ;;  %v1840_v58 = vpack.c.bf16 %v1827_v53, %v1827_v53  ;;  %v1831_v8 = vsel %vm1653_vm1, %v1827_v53, 0.0 }
 0x29f   : > { %v1832_v14 = vadd.f32 %v1831_v8, %v1830_v11  ;;  %v2983_v11 = vld [vmem:[%s3922_s12 + $0x28] sm:$0xff] }
 0x2a0   : > { %v1800_v59 = vadd.f32 %v3079_v47, %v1799_v56  ;;  %2797 = vmatmul.msk.bf16.vlgmr.msrb.gmra.mxu1 %vm1653_vm1, %v1840_v58 }
 0x2a1   : > { %v3081_v60 = vpop.eup %3080 }
 0x2a2   : > { %v1804_v62 = vsel %vm1803_vm14, %v3079_v47, %v1800_v59  ;;  %v1812_v63 = vmul.f32 %v3081_v60, %v1765_v51  ;;  %vm1817_vm0 = vweird.f32 %v3081_v60 }
 0x2a3   : > { %v1809_v0 = vsel %vm1806_vm15, %v1808_v61, %v1804_v62  ;;  %vm1818_vm4 = vmor %vm1816_vm3, %vm1817_vm0  ;;  %v2976_v61 = vld [vmem:[%s3920_s10 + $0x30] sm:$0xff]  ;;  %v2974_v62 = vld [vmem:[%s3920_s10 + $0x20] sm:$0xff] }
 0x2a4   : > { %v1828_v1 = vmul.f32 %v3734_v19, %v1809_v0  ;;  %v1813_v2 = vsub.f32 1.0, %v1812_v63  ;;  %v2973_v63 = vld [vmem:[%s3920_s10 + $0x18] sm:$0xff]  ;;  %v2972_v0 = vld [vmem:[%s3920_s10 + $0x10] sm:$0xff] }
 0x2a6   : > { %v1814_v4 = vmul.f32 %v3081_v60, %v1813_v2  ;;  %v1841_v6 = vpack.c.bf16 %v1828_v1, %v1828_v1  ;;  %v1833_v12 = vsel %vm1653_vm1, %v1828_v1, 0.0  ;;  %v2971_v1 = vld [vmem:[%s3920_s10 + $0x8] sm:$0xff] }
 0x2a7   : > { %v1834_v16 = vadd.f32 %v1833_v12, %v1832_v14  ;;  %v2982_v12 = vld [vmem:[%s3922_s12 + $0x20] sm:$0xff] }
 0x2a8   : > { %v1815_v7 = vadd.f32 %v3081_v60, %v1814_v4  ;;  %2798 = vmatmul.msk.bf16.vlgmr.msrb.gmra.mxu2 %vm1653_vm1, %v1841_v6 }
 0x2aa   : > { %v1819_v10 = vsel %vm1818_vm4, %v3081_v60, %v1815_v7  ;;  %v2977_v60 = vld [vmem:[%s3920_s10 + $0x38] sm:$0xff] }
 0x2ab   : > { %v1824_v13 = vsel %vm1821_vm5, %v1823_v9, %v1819_v10  ;;  %v2985_v7 = vld [vmem:[%s3922_s12 + $0x38] sm:$0xff]  ;;  %v2984_v9 = vld [vmem:[%s3922_s12 + $0x30] sm:$0xff] }
 0x2ac   : > { %v1829_v15 = vmul.f32 %v3738_v22, %v1824_v13  ;;  %v1936_v22 = vsel %vm1850_vm2, %v1928_v21, 0  ;;  %2202 = vmatpush.bf16.msrb.mxu1 %v2985_v7  ;;  %v3060_v21 = vld [vmem:[%s3924_s14] ss:$0 sm:$0xff] }
 0x2ad   : > { %1945 = vmatpush.bf16.msra.mxu0 %v1936_v22 }
 0x2ae   : > { %v1842_v17 = vpack.c.bf16 %v1829_v15, %v1829_v15  ;;  %v1835_v18 = vsel %vm1653_vm1, %v1829_v15, 0.0  ;;  %v2981_v15 = vld [vmem:[%s3922_s12 + $0x18] sm:$0xff] }
 0x2af   : > { %v1836_v19 = vadd.f32 %v1835_v18, %v1834_v16  ;;  %v2980_v18 = vld [vmem:[%s3922_s12 + $0x10] sm:$0xff] }
 0x2b0   : > { %2799 = vmatmul.msk.bf16.vlgmr.msrb.gmra.mxu3 %vm1653_vm1, %v1842_v17  ;;  %2203 = vmatpush.bf16.msrb.mxu1 %v2984_v9 }
 0x2b1   : > { %v1837_v20 = vmul.f32 0.25, %v1836_v19  ;;  %2119 = vmatpush.bf16.msrb.mxu0 %v2977_v60 }
 0x2b3   : > { %1838 = vst.msk [vmem:[%s3758_s1] sm:$0xff] %vm1653_vm1, %v1837_v20 }
 0x2b4   : > { %2204 = vmatpush.bf16.msrb.mxu1 %v2983_v11 }
 0x2b5   : > { %2120 = vmatpush.bf16.msrb.mxu0 %v2976_v61 }
 0x2b8   : > { %2205 = vmatpush.bf16.msrb.mxu1 %v2982_v12 }
 0x2bc   : > { %2206 = vmatpush.bf16.msrb.mxu1 %v2981_v15 }
 0x2c0   : > { %2207 = vmatpush.bf16.msrb.mxu1 %v2980_v18 }
 0x2c4   : > { %2208 = vmatpush.bf16.msrb.mxu1 %v2979_v28 }
 0x315   : > { %v1863_v29 = vpop.f32.mrf.mxu0 }
 0x316   : > { %v1924_v30 = vpack.c.bf16 %v1863_v29, %v1863_v29  ;;  %v2978_v29 = vld [vmem:[%s3922_s12] sm:$0xff] }
 0x317   : > { %2209 = vmatpush.bf16.msrb.mxu1 %v2978_v29 }
 0x318   : > { %2800 = vmatmul.msk.bf16.vlgmr.msra.gmra.mxu0 %vm1653_vm1, %v1924_v30  ;;  %v3062_v30 = vld [vmem:[%s3921_s11] ss:$0 sm:$0xff] }
 0x31d   : > { %v1865_v31 = vpop.f32.mrf.mxu0  ;;  %v1882_v33 = vpop.f32.mrf.mxu1 }
 0x31e   : > { %v1925_v34 = vpack.c.bf16 %v1882_v33, %v1882_v33 }
 0x320   : > { %2801 = vmatmul.msk.bf16.vlgmr.msra.gmra.mxu1 %vm1653_vm1, %v1925_v34 }
 0x325   : > { %v1884_v35 = vpop.f32.mrf.mxu1 }
 0x32b   : > { %v1901_v36 = vpop.f32.mrf.mxu2 }
 0x32c   : > { %v1926_v38 = vpack.c.bf16 %v1901_v36, %v1901_v36 }
 0x32e   : > { %2802 = vmatmul.msk.bf16.vlgmr.msra.gmra.mxu2 %vm1653_vm1, %v1926_v38  ;;  %v3063_v38 = vld [vmem:[%s3923_s13] ss:$0 sm:$0xff] }
 0x333   : > { %v1903_v39 = vpop.f32.mrf.mxu2  ;;  %v1920_v40 = vpop.f32.mrf.mxu3 }
 0x334   : > { %v1927_v41 = vpack.c.bf16 %v1920_v40, %v1920_v40 }
 0x336   : > { %2803 = vmatmul.msk.bf16.vlgmr.msra.gmra.mxu3 %vm1653_vm1, %v1927_v41 }
 0x33b   : > { %v1922_v42 = vpop.f32.mrf.mxu3 }
 0x395   : > { %v1947_v43 = vpop.f32.mrf.mxu0 }
 0x39d   : > { %v1949_v37 = vpop.f32.mrf.mxu0  ;;  %v1966_v44 = vpop.f32.mrf.mxu1 }
 0x39e   : > { %v2008_v47 = vadd.f32 %v1966_v44, %v1947_v43 }
 0x3a5   : > { %v1968_v45 = vpop.f32.mrf.mxu1 }
 0x3b1   : > { %v1985_v46 = vpop.f32.mrf.mxu2 }
 0x3b2   : > { %v2009_v48 = vadd.f32 %v2008_v47, %v1985_v46 }
 0x3b9   : > { %v1987_v50 = vpop.f32.mrf.mxu2  ;;  %v2004_v51 = vpop.f32.mrf.mxu3 }
 0x3ba   : > { %v2010_v52 = vadd.f32 %v2009_v48, %v2004_v51 }
 0x3bc   : > { %v2015_v53 = vadd.f32 %v3059_v49, %v2010_v52 }
 0x3be   : > { %v2016_v54 = vadd.f32 %v2015_v53, %v3458_v32  ;;  %v2975_v32 = vld [vmem:[%s3920_s10 + $0x28] sm:$0xff] }
 0x3bf   : > { %2121 = vmatpush.bf16.msrb.mxu0 %v2975_v32 }
 0x3c0   : > { %2019 = vadd.xlane.f32.xlu2 %v2016_v54 }
 0x3c1   : > { %v2006_v55 = vpop.f32.mrf.mxu3 }
 0x3c3   : > { %2122 = vmatpush.bf16.msrb.mxu0 %v2974_v62 }
 0x3c7   : > { %2123 = vmatpush.bf16.msrb.mxu0 %v2973_v63 }
 0x3cb   : > { %2124 = vmatpush.bf16.msrb.mxu0 %v2972_v0 }
 0x3cf   : > { %2125 = vmatpush.bf16.msrb.mxu0 %v2971_v1 }
 0x3d3   : > { %2126 = vmatpush.bf16.msrb.mxu0 %v2970_v3 }
 0x433   : > { %v2020_v56 = vpop.xlane.xlu2 %2019 }
 0x434   : > { %v2021_v57 = vmul.f32 0.03125, %v2020_v56 }
 0x436   : > { %v2022_v58 = vsub.f32 %v2016_v54, %v2021_v57  ;;  %v2026_v2 = vmul.f32 96.0, %v2021_v57 }
 0x438   : > { %v2023_v59 = vmul.f32 %v2022_v58, %v2022_v58  ;;  %v2027_v4 = vmul.f32 %v2026_v2, %v2021_v57 }
 0x43a   : > { %2024 = vadd.xlane.f32.xlu0 %v2023_v59 }
 0x4ad   : > { %v2025_v5 = vpop.xlane.xlu0 %2024 }
 0x4ae   : > { %v2028_v6 = vsub.f32 %v2025_v5, %v2027_v4 }
 0x4b0   : > { %v2029_v8 = vmul.f32 0.03125, %v2028_v6 }
 0x4b2   : > { %v2030_v10 = vadd.f32 1e-05, %v2029_v8 }
 0x4b4   : > { %3082 = vrsqrt.f32 %v2030_v10  ;;  %vm2037_vm2 = vweird.f32 %v2030_v10 }
 0x4ba   : > { %v3083_v13 = vpop.eup %3082 }
 0x4bb   : > { %v2032_v14 = vmul.f32 %v3083_v13, %v2030_v10  ;;  %vm2038_vm1 = vweird.f32 %v3083_v13 }
 0x4bc   : > { %vm2039_vm6 = vmor %vm2037_vm2, %vm2038_vm1 }
 0x4bd   : > { %v2033_v16 = vmul.f32 %v3083_v13, %v2032_v14 }
 0x4bf   : > { %v2034_v17 = vmul.f32 0.5, %v2033_v16 }
 0x4c1   : > { %v2035_v19 = vsub.f32 1.5, %v2034_v17 }
 0x4c3   : > { %v2036_v20 = vmul.f32 %v3083_v13, %v2035_v19 }
 0x4c5   : > { %v2040_v22 = vsel %vm2039_vm6, %v3083_v13, %v2036_v20 }
 0x4c6   : > { %v2041_v23 = vmul.f32 %v2040_v22, %v2022_v58 }
 0x4c8   : > { %v2045_v25 = vmul.f32 %v3060_v21, %v2041_v23 }
 0x4ca   : > { %v2049_v26 = vadd.f32 %v3061_v24, %v2045_v25 }
 0x4cc   : > { %v2050_v27 = vpack.c.bf16 %v2049_v26, %v2049_v26 }
 0x4ce   : > { %2127 = vmatmul.bf16.vlgmr.msrb.gmra.mxu0 %v2050_v27 }
 0x54b   : > { %v2128_v31 = vpop.f32.mrf.mxu0 }
 0x54c   : > { %v2129_v33 = vadd.f32 %v3062_v30, %v2128_v31 }
 0x54e   : > { %v2132_v34 = vmax.f32 %v2129_v33, 0.0 }
 0x550   : > { %v2133_v35 = vpack.c.bf16 %v2132_v34, %v2132_v34 }
 0x552   : > { %2210 = vmatmul.bf16.vlgmr.msrb.gmra.mxu1 %v2133_v35 }
 0x553   : > { %v2130_v36 = vpop.f32.mrf.mxu0 }
 0x5cf   : > { %v2211_v39 = vpop.f32.mrf.mxu1 }
 0x5d0   : > { %v2212_v40 = vadd.f32 %v3063_v38, %v2211_v39 }
 0x5d2   : > { %v2215_v41 = vadd.f32 %v2212_v40, %v2049_v26 }
 0x5d4   : > { %2218 = vadd.xlane.f32.xlu1 %v2215_v41 }
 0x5d7   : > { %v2213_v42 = vpop.f32.mrf.mxu1 }
 0x647   : > { %v2219_v43 = vpop.xlane.xlu1 %2218 }
 0x648   : > { %v2220_v37 = vmul.f32 0.03125, %v2219_v43 }
 0x64a   : > { %v2221_v44 = vsub.f32 %v2215_v41, %v2220_v37 }
 0x64c   : > { %v2222_v45 = vmul.f32 %v2221_v44, %v2221_v44 }
 0x64e   : > { %2223 = vadd.xlane.f32.xlu2 %v2222_v45 }
 0x64f   : > { %3113 = shalt.err (!%p3110_p5)
}
 0x650   : > { %2987 = dma.vmem_to_hbm [thread:$0]  (%p3339_p4), %s2285_s2, 128, %s2287_s17, %s2256_s0   ;;  %v2225_v46 = vmul.f32 96.0, %v2220_v37  ;;  %v3064_v58 = vld [vmem:[%s3926_s16] ss:$0 sm:$0xff] }
 0x651   : > { %s3969_s1 = sld [smem:[#allocation26_spill]]  ;;  %s3972_s0 = sshll.u32 %s3748_s24, 3 }
 0x652   : > { %v2226_v47 = vmul.f32 %v2225_v46, %v2220_v37  ;;  %s3971_s17 = sld [smem:[#allocation25_spill]]  ;;  %s624_s27 = scalar_lea.vmem [#allocation4], %s3972_s0 }
 0x653   : > { %s2269_s20 = sshll.u32 %s624_s27, 4  ;;  %s2251_s21 = scalar_lea.sflag [#allocation5], %s3748_s24  ;;  %s2270_s20 = int_to_ptr.vmem [resolvable:$true] %s2269_s20 }
 0x657   : > { %s3970_s25 = smov %s3969_s1  ;;  %s2267_s18 = scalar_lea.hbm %s3969_s1, %s2870_s26 }
 0x658   : > { %v3065_v61 = vld [vmem:[%s3971_s17] ss:$0 sm:$0xff]  ;;  %s2271_s22 = sshll.u32 %s2267_s18, 4  ;;  %s3134_s7 = scalar_lea.hbm %s3970_s25, 16  ;;  %s2272_s22 = int_to_ptr.hbm [resolvable:$true] %s2271_s22 }
 0x659   : > { %s3128_s4 = sshra.s32 %s2272_s22, 4  ;;  %s3129_s4 = int_to_ptr.hbm [resolvable:$true] %s3128_s4 }
 0x65a   : > { %s3130_s26 = scalar_lea.hbm %s3129_s4, 8  ;;  %p3135_p10 = scmp.lt.s32.totalorder %s3129_s4, %s3970_s25 }
 0x65b   : > { %p3131_p6 = scmp.ne.s32.totalorder %s3129_s4, %s3130_s26  ;;  %p3136_p11 = scmp.lt.s32.totalorder %s3134_s7, %s3130_s26 }
 0x65d   : > { %p3132_p7 = pnand %p3131_p6, %p3339_p4  ;;  %p3137_p12 = por %p3136_p11, %p3135_p10 }
 0x65f   : > { %p3133_p9 = pneg %p3132_p7 }
 0x661   : > { %p3138_p13 = pnand %p3137_p12, %p3133_p9 }
 0x6c1   : > { %v2224_v48 = vpop.xlane.xlu2 %2223 }
 0x6c2   : > { %v2227_v49 = vsub.f32 %v2224_v48, %v2226_v47 }
 0x6c4   : > { %v2228_v50 = vmul.f32 0.03125, %v2227_v49 }
 0x6c6   : > { %v2229_v51 = vadd.f32 1e-05, %v2228_v50 }
 0x6c8   : > { %3084 = vrsqrt.f32 %v2229_v51  ;;  %vm2236_vm8 = vweird.f32 %v2229_v51 }
 0x6ce   : > { %v3085_v52 = vpop.eup %3084 }
 0x6cf   : > { %v2231_v53 = vmul.f32 %v3085_v52, %v2229_v51  ;;  %vm2237_vm7 = vweird.f32 %v3085_v52 }
 0x6d0   : > { %vm2238_vm9 = vmor %vm2236_vm8, %vm2237_vm7 }
 0x6d1   : > { %v2232_v54 = vmul.f32 %v3085_v52, %v2231_v53 }
 0x6d3   : > { %v2233_v55 = vmul.f32 0.5, %v2232_v54 }
 0x6d5   : > { %v2234_v56 = vsub.f32 1.5, %v2233_v55 }
 0x6d7   : > { %v2235_v57 = vmul.f32 %v3085_v52, %v2234_v56 }
 0x6d9   : > { %v2239_v59 = vsel %vm2238_vm9, %v3085_v52, %v2235_v57 }
 0x6da   : > { %v2240_v60 = vmul.f32 %v2239_v59, %v2221_v44 }
 0x6dc   : > { %v2244_v32 = vmul.f32 %v3064_v58, %v2240_v60 }
 0x6de   : > { %v2248_v62 = vadd.f32 %v3065_v61, %v2244_v32 }
 0x6e0   : > { %2249 = vst [vmem:[%s624_s27] sm:$0xff] %v2248_v62 }
 0x6e1   : > { %3141 = shalt.err (!%p3138_p13)
}
 0x6e2   : > { %2986 = dma.vmem_to_hbm [thread:$0]  (%p3339_p4), %s2270_s20, 128, %s2272_s22, %s2251_s21  }
 0x6e3 PF: > { %s3973_s24 = sld [smem:[#allocation13_spill]] }
 0x6e4   : > { %s3974_s18 = sld [smem:[#allocation10_spill]] }
 0x6e9   : > { %p2997_p0 = scmp.ge.s32.totalorder %s3973_s24, 2 }
 0x6ea   : > { %s2298_s17 = sand.u32 1, %s3974_s18  }
 0x6eb   : > { %p2991_p1 = pnand %p2997_p0, %p3346_p8  ;;  %s2299_s0 = scalar_lea.sflag [#allocation5], %s2298_s17 }
 0x6ed   : > { %p2992_p2 = pneg %p2991_p1 }
 0x6ef   : > { %3167 = dma.done.wait (%p2992_p2), %s2299_s0, 128  }
 0x6f0   : > { %3169 = vsyncadd (%p2992_p2), %s2299_s0, 4294967168  ;;  %s2309_s27 = scalar_lea.sflag [#allocation7], %s2298_s17 }
 0x6f1   : > { %3171 = dma.done.wait (%p2992_p2), %s2309_s27, 128  }
 0x6f2   : > { %3173 = vsyncadd (%p2992_p2), %s2309_s27, 4294967168  ;;  %s36_s22 = sadd.s32 1, %s3973_s24   ;;  %s3976_s3 = sld [smem:[#allocation11_spill]] }
 0x6f3   : > { %p33_p3 = scmp.ge.s32.totalorder %s36_s22, 4   ;;  %s3977_s20 = sld [smem:[#allocation16_spill]] }
 0x6f4   : > { %s3978_s21 = sld [smem:[#allocation12_spill]]  ;;  %s3980_s0 = smov %s3180_s30 }
 0x6f5   : > { %s3979_s1 = sld [smem:[#allocation14_spill]]  ;;  %35 = sbr.rel (!%p33_p3) target bundleno = 17 (0x11), region = 152 }
 0x6f8   : > { %s3981_s30 = smov %s3976_s3 }
 0x6fa   :  { %2315 = vsyncpa [#allocation5], 1 }
 0x6fb   :  { %2317 = vsyncpa [#allocation5 + $0x1], 1 }
 0x6fc   :  { %2318 = vsyncpa [#allocation7], 1 }
 0x6fd   :  { %2320 = vsyncpa [#allocation7 + $0x1], 1 }

</bundles_post_ra>
